<compile_context>
chip_gen: v7x
topology: tpu7x:2x2x1
jax: 0.10.0
libtpu: 0.0.40
codegen_flags: <defaults>
</compile_context>

<pallas_src>
import numpy as np
import jax
import jax.numpy as jnp
from jax import lax
from jax.experimental import pallas as pl
from jax.experimental.pallas import tpu as pltpu


# ----------------------------- Pallas kernel --------------------------------

def lstm_mlp_kernel(x_ref,                       # (T*B, D)  time-major, flattened
                    mask_ref,                    # (B, 1)
                    w1x_ref, w1h_ref, b1_ref,    # (D,4H1) (H1,4H1) (1,4H1)
                    w2x_ref, w2h_ref, b2_ref,    # (H1,4H2) (H2,4H2) (1,4H2)
                    wh_ref, bh_ref,              # folded MLP head (H2,1) (1,1)
                    out_ref,                     # (B, 1)
                    gx1_ref,                     # scratch (T, B, 4H1)
                    h1_ref,                      # scratch (T, B, H1)
                    gx2_ref):                    # scratch (T, B, 4H2)
    T, B, G1 = gx1_ref.shape
    H1 = G1 // 4
    H2 = gx2_ref.shape[2] // 4
    f32 = jnp.float32
    unroll = min(T, 8)                           # bounded unroll (review item)

    def cell(gates, c, H):
        i = jax.nn.sigmoid(gates[:, 0:H])
        f = jax.nn.sigmoid(gates[:, H:2 * H])
        g = jnp.tanh(gates[:, 2 * H:3 * H])
        o = jax.nn.sigmoid(gates[:, 3 * H:4 * H])
        c_new = f * c + i * g
        h_new = o * jnp.tanh(c_new)
        return h_new, c_new

    # Stage 1: time-batched input projection for layer 1 (one big MXU matmul).
    gx1 = jnp.dot(x_ref[...], w1x_ref[...], preferred_element_type=f32)  # (T*B, 4H1)
    gx1_ref[...] = gx1.reshape(T, B, 4 * H1) + b1_ref[...]               # bias hoisted

    # Stage 2: layer-1 recurrence — only h @ W1h on the serial chain.
    w1h = w1h_ref[...]

    def step1(t, carry):
        h, c = carry
        g = gx1_ref[t] + jnp.dot(h, w1h, preferred_element_type=f32)
        h, c = cell(g, c, H1)
        h1_ref[t] = h
        return (h, c)

    lax.fori_loop(0, T, step1,
                  (jnp.zeros((B, H1), f32), jnp.zeros((B, H1), f32)),
                  unroll=unroll)

    # Stage 3: time-batched input projection for layer 2.
    gx2 = jnp.dot(h1_ref[...].reshape(T * B, H1), w2x_ref[...],
                  preferred_element_type=f32)                            # (T*B, 4H2)
    gx2_ref[...] = gx2.reshape(T, B, 4 * H2) + b2_ref[...]

    # Stage 4: layer-2 recurrence.
    w2h = w2h_ref[...]

    def step2(t, carry):
        h, c = carry
        g = gx2_ref[t] + jnp.dot(h, w2h, preferred_element_type=f32)
        return cell(g, c, H2)

    h2, _ = lax.fori_loop(0, T, step2,
                          (jnp.zeros((B, H2), f32), jnp.zeros((B, H2), f32)),
                          unroll=unroll)

    # Stage 5: packed-sequence masking of the final hidden state + folded head.
    last = h2 * mask_ref[...]
    out_ref[...] = jnp.dot(last, wh_ref[...],
                           preferred_element_type=f32) + bh_ref[...]


# ------------------------------ Wrapper --------------------------------------

def two_layer_lstm_forward(x, lengths, params):
    """x: (B, T, D) float32, lengths: host numpy int array (B,)."""
    B, _, D = x.shape
    lengths = np.asarray(lengths)
    T = int(np.max(lengths))            # pad_packed_sequence pads to max(lengths)
    x = x[:, :T, :]

    # Pad batch to a multiple of 8 (f32 sublane count); padded rows are masked.
    B_pad = int(-(-B // 8) * 8)
    if B_pad != B:
        x = jnp.pad(x, ((0, B_pad - B), (0, 0), (0, 0)))

    # Time-major, flattened so layer 1's input projection is one (T*B, D) matmul.
    x_tm = jnp.transpose(x, (1, 0, 2)).reshape(T * B_pad, D)

    mask_np = np.zeros((B_pad, 1), np.float32)
    mask_np[:B, 0] = (lengths == T).astype(np.float32)
    mask = jnp.asarray(mask_np)

    # Fold the activation-free MLP head (fc -> drop -> l1 -> drop -> l2 -> l3)
    # into a single affine map.  Valid only because eval-mode dropout is the
    # identity and there is no nonlinearity between these layers.
    w_head = params["wfc"] @ params["wl1"] @ params["wl2"] @ params["wl3"]      # (H2, 1)
    b_head = ((params["bfc"] @ params["wl1"] + params["bl1"]) @ params["wl2"]
              + params["bl2"]) @ params["wl3"] + params["bl3"]                  # (1, 1)

    H1 = params["w1h"].shape[0]
    H2 = params["w2h"].shape[0]

    out = pl.pallas_call(
        lstm_mlp_kernel,
        out_shape=jax.ShapeDtypeStruct((B_pad, 1), jnp.float32),
        # No grid: whole problem is VMEM-resident once (single-buffered),
        # no pipeline/DMA bookkeeping.
        scratch_shapes=[
            pltpu.VMEM((T, B_pad, 4 * H1), jnp.float32),   # layer-1 x-gates
            pltpu.VMEM((T, B_pad, H1), jnp.float32),       # layer-1 hidden seq
            pltpu.VMEM((T, B_pad, 4 * H2), jnp.float32),   # layer-2 x-gates
        ],
        compiler_params=pltpu.CompilerParams(
            vmem_limit_bytes=32 * 1024 * 1024),            # v5e default is 16 MiB
    )(x_tm, mask,
      params["w1x"], params["w1h"], params["b1"],
      params["w2x"], params["w2h"], params["b2"],
      w_head, b_head)

    return out[:B]


# --------------------------- Parameter init ----------------------------------

def init_params(key, input_dim, h1, h2, output_dim):
    def uniform(key, shape, k):
        return jax.random.uniform(key, shape, jnp.float32, -k, k)

    keys = jax.random.split(key, 20)
    k1 = 1.0 / np.sqrt(h1)
    k2 = 1.0 / np.sqrt(h2)
    p = {}
    # LSTM 1: PyTorch weight_ih_l0 is (4H1, D); store transposed (D, 4H1).
    p["w1x"] = uniform(keys[0], (input_dim, 4 * h1), k1)
    p["w1h"] = uniform(keys[1], (h1, 4 * h1), k1)
    p["b1"] = uniform(keys[2], (1, 4 * h1), k1) + uniform(keys[3], (1, 4 * h1), k1)
    # LSTM 2
    p["w2x"] = uniform(keys[4], (h1, 4 * h2), k2)
    p["w2h"] = uniform(keys[5], (h2, 4 * h2), k2)
    p["b2"] = uniform(keys[6], (1, 4 * h2), k2) + uniform(keys[7], (1, 4 * h2), k2)
    # fc: (H2 -> output_dim)
    kfc = 1.0 / np.sqrt(h2)
    p["wfc"] = uniform(keys[8], (h2, output_dim), kfc)
    p["bfc"] = uniform(keys[9], (1, output_dim), kfc)
    # linear1: output_dim -> 32
    kl1 = 1.0 / np.sqrt(output_dim)
    p["wl1"] = uniform(keys[10], (output_dim, 32), kl1)
    p["bl1"] = uniform(keys[11], (1, 32), kl1)
    # linear2: 32 -> 16
    kl2 = 1.0 / np.sqrt(32)
    p["wl2"] = uniform(keys[12], (32, 16), kl2)
    p["bl2"] = uniform(keys[13], (1, 16), kl2)
    # linear3: 16 -> 1
    kl3 = 1.0 / np.sqrt(16)
    p["wl3"] = uniform(keys[14], (16, 1), kl3)
    p["bl3"] = uniform(keys[15], (1, 1), kl3)
    return p


# -------------------------- Pure-JAX reference -------------------------------

def reference_forward(x, lengths, p):
    T = int(np.max(lengths))
    x = x[:, :T, :]

    def run_lstm(x_seq, wx, wh, b):
        B = x_seq.shape[0]
        H = wh.shape[0]
        h = jnp.zeros((B, H), jnp.float32)
        c = jnp.zeros((B, H), jnp.float32)
        outs = []
        for t in range(x_seq.shape[1]):
            gates = x_seq[:, t] @ wx + h @ wh + b
            i = jax.nn.sigmoid(gates[:, :H])
            f = jax.nn.sigmoid(gates[:, H:2 * H])
            g = jnp.tanh(gates[:, 2 * H:3 * H])
            o = jax.nn.sigmoid(gates[:, 3 * H:])
            c = f * c + i * g
            h = o * jnp.tanh(c)
            outs.append(h)
        return jnp.stack(outs, axis=1)

    out1 = run_lstm(x, p["w1x"], p["w1h"], p["b1"])
    out2 = run_lstm(out1, p["w2x"], p["w2h"], p["b2"])
    mask = (jnp.asarray(lengths) == T)[:, None]
    last = jnp.where(mask, out2[:, -1, :], 0.0)   # packed-sequence padding -> 0
    z = last @ p["wfc"] + p["bfc"]
    z = z @ p["wl1"] + p["bl1"]
    z = z @ p["wl2"] + p["bl2"]
    z = z @ p["wl3"] + p["bl3"]
    return z


# --------------------------------- Main ---------------------------------------

if __name__ == "__main__":
    B, T, D = 4, 8, 16
    H1, H2, OUT = 32, 32, 8

    key = jax.random.PRNGKey(0)
    kx, kp = jax.random.split(key)
    x = jax.random.normal(kx, (B, T, D), jnp.float32)
    lengths = np.array([8, 5, 8, 3], dtype=np.int32)  # host-side, like PyTorch
    params = init_params(kp, D, H1, H2, OUT)

    out = two_layer_lstm_forward(x, lengths, params)
    out = jax.block_until_ready(out)

    ref = reference_forward(x, lengths, params)
    np.testing.assert_allclose(np.asarray(out), np.asarray(ref),
                               rtol=1e-5, atol=1e-5)
    print("KERNEL_OK")
</pallas_src>

<mosaic_0001>
module attributes {stable_mosaic.version = 11 : i64} {
  func.func @lstm_mlp_kernel(%arg0: memref<64x16xf32, #tpu.memory_space<vmem>>, %arg1: memref<8x1xf32, #tpu.memory_space<vmem>>, %arg2: memref<16x128xf32, #tpu.memory_space<vmem>>, %arg3: memref<32x128xf32, #tpu.memory_space<vmem>>, %arg4: memref<1x128xf32, #tpu.memory_space<vmem>>, %arg5: memref<32x128xf32, #tpu.memory_space<vmem>>, %arg6: memref<32x128xf32, #tpu.memory_space<vmem>>, %arg7: memref<1x128xf32, #tpu.memory_space<vmem>>, %arg8: memref<32x1xf32, #tpu.memory_space<vmem>>, %arg9: memref<1x1xf32, #tpu.memory_space<vmem>>, %arg10: memref<8x1xf32, #tpu.memory_space<vmem>>, %arg11: memref<8x8x128xf32, #tpu.memory_space<vmem>>, %arg12: memref<8x8x32xf32, #tpu.memory_space<vmem>>, %arg13: memref<8x8x128xf32, #tpu.memory_space<vmem>>) attributes {dimension_semantics = [], scalar_prefetch = 0 : i64, scratch_operands = 3 : i64, tpu.core_type = #tpu.core_type<tc>} {
    %c0 = arith.constant 0 : index
    %c0_0 = arith.constant 0 : index
    %0 = vector.load %arg0[%c0, %c0_0] : memref<64x16xf32, #tpu.memory_space<vmem>>, vector<64x16xf32>
    %c0_1 = arith.constant 0 : index
    %c0_2 = arith.constant 0 : index
    %1 = vector.load %arg2[%c0_1, %c0_2] : memref<16x128xf32, #tpu.memory_space<vmem>>, vector<16x128xf32>
    %cst = arith.constant dense<0.000000e+00> : vector<64x128xf32>
    %2 = tpu.matmul %0, %1, %cst {dimension_numbers = #tpu.dot_dimension_numbers<[1], [0], [0], [1], [0, 0, 1, 1], [], []>} : vector<64x16xf32>, vector<16x128xf32>, vector<64x128xf32> -> vector<64x128xf32>
    %3 = vector.shape_cast %2 : vector<64x128xf32> to vector<8x8x128xf32>
    %c0_3 = arith.constant 0 : index
    %c0_4 = arith.constant 0 : index
    %4 = vector.load %arg4[%c0_3, %c0_4] : memref<1x128xf32, #tpu.memory_space<vmem>>, vector<1x128xf32>
    %5 = vector.shape_cast %4 : vector<1x128xf32> to vector<1x1x128xf32>
    %6 = vector.broadcast %5 : vector<1x1x128xf32> to vector<8x8x128xf32>
    %7 = arith.addf %3, %6 : vector<8x8x128xf32>
    %c0_5 = arith.constant 0 : index
    %c0_6 = arith.constant 0 : index
    %c0_7 = arith.constant 0 : index
    %8 = vector.load %arg11[%c0_5, %c0_6, %c0_7] : memref<8x8x128xf32, #tpu.memory_space<vmem>>, vector<8x8x128xf32>
    tpu.vector_store %arg11[%c0_5, %c0_6, %c0_7], %7 {strides = array<i32>} : memref<8x8x128xf32, #tpu.memory_space<vmem>>, vector<8x8x128xf32>,
    %c0_8 = arith.constant 0 : index
    %c0_9 = arith.constant 0 : index
    %9 = vector.load %arg3[%c0_8, %c0_9] : memref<32x128xf32, #tpu.memory_space<vmem>>, vector<32x128xf32>
    %cst_10 = arith.constant 0.000000e+00 : f32
    %10 = vector.broadcast %cst_10 : f32 to vector<8x32xf32>
    %cst_11 = arith.constant 0.000000e+00 : f32
    %11 = vector.broadcast %cst_11 : f32 to vector<8x32xf32>
    %c0_i32 = arith.constant 0 : i32
    %12 = arith.index_cast %c0_i32 : i32 to index
    %c0_12 = arith.constant 0 : index
    %c0_13 = arith.constant 0 : index
    %13 = vector.load %arg11[%12, %c0_12, %c0_13] : memref<8x8x128xf32, #tpu.memory_space<vmem>>, vector<1x8x128xf32>
    %14 = vector.shape_cast %13 : vector<1x8x128xf32> to vector<8x128xf32>
    %cst_14 = arith.constant dense<0.000000e+00> : vector<8x128xf32>
    %15 = tpu.matmul %10, %9, %cst_14 {dimension_numbers = #tpu.dot_dimension_numbers<[1], [0], [0], [1], [0, 0, 1, 1], [], []>} : vector<8x32xf32>, vector<32x128xf32>, vector<8x128xf32> -> vector<8x128xf32>
    %16 = arith.addf %14, %15 : vector<8x128xf32>
    %17 = vector.extract_strided_slice %16 {offsets = [0, 0], sizes = [8, 32], strides = [1, 1]} : vector<8x128xf32> to vector<8x32xf32>
    %18 = arith.negf %17 : vector<8x32xf32>
    %19 = math.exp %18 : vector<8x32xf32>
    %cst_15 = arith.constant 1.000000e+00 : f32
    %20 = vector.broadcast %cst_15 : f32 to vector<8x32xf32>
    %21 = arith.addf %20, %19 : vector<8x32xf32>
    %22 = arith.divf %20, %21 : vector<8x32xf32>
    %23 = vector.extract_strided_slice %16 {offsets = [0, 32], sizes = [8, 32], strides = [1, 1]} : vector<8x128xf32> to vector<8x32xf32>
    %24 = arith.negf %23 : vector<8x32xf32>
    %25 = math.exp %24 : vector<8x32xf32>
    %cst_16 = arith.constant 1.000000e+00 : f32
    %26 = vector.broadcast %cst_16 : f32 to vector<8x32xf32>
    %27 = arith.addf %26, %25 : vector<8x32xf32>
    %28 = arith.divf %26, %27 : vector<8x32xf32>
    %29 = vector.extract_strided_slice %16 {offsets = [0, 64], sizes = [8, 32], strides = [1, 1]} : vector<8x128xf32> to vector<8x32xf32>
    %30 = math.tanh %29 : vector<8x32xf32>
    %31 = vector.extract_strided_slice %16 {offsets = [0, 96], sizes = [8, 32], strides = [1, 1]} : vector<8x128xf32> to vector<8x32xf32>
    %32 = arith.negf %31 : vector<8x32xf32>
    %33 = math.exp %32 : vector<8x32xf32>
    %cst_17 = arith.constant 1.000000e+00 : f32
    %34 = vector.broadcast %cst_17 : f32 to vector<8x32xf32>
    %35 = arith.addf %34, %33 : vector<8x32xf32>
    %36 = arith.divf %34, %35 : vector<8x32xf32>
    %37 = arith.mulf %28, %11 : vector<8x32xf32>
    %38 = arith.mulf %22, %30 : vector<8x32xf32>
    %39 = arith.addf %37, %38 : vector<8x32xf32>
    %40 = math.tanh %39 : vector<8x32xf32>
    %41 = arith.mulf %36, %40 : vector<8x32xf32>
    %42 = arith.index_cast %c0_i32 : i32 to index
    %c0_18 = arith.constant 0 : index
    %c0_19 = arith.constant 0 : index
    %43 = vector.load %arg12[%42, %c0_18, %c0_19] : memref<8x8x32xf32, #tpu.memory_space<vmem>>, vector<1x8x32xf32>
    %44 = vector.shape_cast %43 : vector<1x8x32xf32> to vector<8x32xf32>
    %45 = vector.shape_cast %41 : vector<8x32xf32> to vector<1x8x32xf32>
    tpu.vector_store %arg12[%42, %c0_18, %c0_19], %45 {strides = array<i32>} : memref<8x8x32xf32, #tpu.memory_space<vmem>>, vector<1x8x32xf32>,
    %c1_i32 = arith.constant 1 : i32
    %46 = arith.index_cast %c1_i32 : i32 to index
    %c0_20 = arith.constant 0 : index
    %c0_21 = arith.constant 0 : index
    %47 = vector.load %arg11[%46, %c0_20, %c0_21] : memref<8x8x128xf32, #tpu.memory_space<vmem>>, vector<1x8x128xf32>
    %48 = vector.shape_cast %47 : vector<1x8x128xf32> to vector<8x128xf32>
    %cst_22 = arith.constant dense<0.000000e+00> : vector<8x128xf32>
    %49 = tpu.matmul %41, %9, %cst_22 {dimension_numbers = #tpu.dot_dimension_numbers<[1], [0], [0], [1], [0, 0, 1, 1], [], []>} : vector<8x32xf32>, vector<32x128xf32>, vector<8x128xf32> -> vector<8x128xf32>
    %50 = arith.addf %48, %49 : vector<8x128xf32>
    %51 = vector.extract_strided_slice %50 {offsets = [0, 0], sizes = [8, 32], strides = [1, 1]} : vector<8x128xf32> to vector<8x32xf32>
    %52 = arith.negf %51 : vector<8x32xf32>
    %53 = math.exp %52 : vector<8x32xf32>
    %cst_23 = arith.constant 1.000000e+00 : f32
    %54 = vector.broadcast %cst_23 : f32 to vector<8x32xf32>
    %55 = arith.addf %54, %53 : vector<8x32xf32>
    %56 = arith.divf %54, %55 : vector<8x32xf32>
    %57 = vector.extract_strided_slice %50 {offsets = [0, 32], sizes = [8, 32], strides = [1, 1]} : vector<8x128xf32> to vector<8x32xf32>
    %58 = arith.negf %57 : vector<8x32xf32>
    %59 = math.exp %58 : vector<8x32xf32>
    %cst_24 = arith.constant 1.000000e+00 : f32
    %60 = vector.broadcast %cst_24 : f32 to vector<8x32xf32>
    %61 = arith.addf %60, %59 : vector<8x32xf32>
    %62 = arith.divf %60, %61 : vector<8x32xf32>
    %63 = vector.extract_strided_slice %50 {offsets = [0, 64], sizes = [8, 32], strides = [1, 1]} : vector<8x128xf32> to vector<8x32xf32>
    %64 = math.tanh %63 : vector<8x32xf32>
    %65 = vector.extract_strided_slice %50 {offsets = [0, 96], sizes = [8, 32], strides = [1, 1]} : vector<8x128xf32> to vector<8x32xf32>
    %66 = arith.negf %65 : vector<8x32xf32>
    %67 = math.exp %66 : vector<8x32xf32>
    %cst_25 = arith.constant 1.000000e+00 : f32
    %68 = vector.broadcast %cst_25 : f32 to vector<8x32xf32>
    %69 = arith.addf %68, %67 : vector<8x32xf32>
    %70 = arith.divf %68, %69 : vector<8x32xf32>
    %71 = arith.mulf %62, %39 : vector<8x32xf32>
    %72 = arith.mulf %56, %64 : vector<8x32xf32>
    %73 = arith.addf %71, %72 : vector<8x32xf32>
    %74 = math.tanh %73 : vector<8x32xf32>
    %75 = arith.mulf %70, %74 : vector<8x32xf32>
    %76 = arith.index_cast %c1_i32 : i32 to index
    %c0_26 = arith.constant 0 : index
    %c0_27 = arith.constant 0 : index
    %77 = vector.load %arg12[%76, %c0_26, %c0_27] : memref<8x8x32xf32, #tpu.memory_space<vmem>>, vector<1x8x32xf32>
    %78 = vector.shape_cast %77 : vector<1x8x32xf32> to vector<8x32xf32>
    %79 = vector.shape_cast %75 : vector<8x32xf32> to vector<1x8x32xf32>
    tpu.vector_store %arg12[%76, %c0_26, %c0_27], %79 {strides = array<i32>} : memref<8x8x32xf32, #tpu.memory_space<vmem>>, vector<1x8x32xf32>,
    %c2_i32 = arith.constant 2 : i32
    %80 = arith.index_cast %c2_i32 : i32 to index
    %c0_28 = arith.constant 0 : index
    %c0_29 = arith.constant 0 : index
    %81 = vector.load %arg11[%80, %c0_28, %c0_29] : memref<8x8x128xf32, #tpu.memory_space<vmem>>, vector<1x8x128xf32>
    %82 = vector.shape_cast %81 : vector<1x8x128xf32> to vector<8x128xf32>
    %cst_30 = arith.constant dense<0.000000e+00> : vector<8x128xf32>
    %83 = tpu.matmul %75, %9, %cst_30 {dimension_numbers = #tpu.dot_dimension_numbers<[1], [0], [0], [1], [0, 0, 1, 1], [], []>} : vector<8x32xf32>, vector<32x128xf32>, vector<8x128xf32> -> vector<8x128xf32>
    %84 = arith.addf %82, %83 : vector<8x128xf32>
    %85 = vector.extract_strided_slice %84 {offsets = [0, 0], sizes = [8, 32], strides = [1, 1]} : vector<8x128xf32> to vector<8x32xf32>
    %86 = arith.negf %85 : vector<8x32xf32>
    %87 = math.exp %86 : vector<8x32xf32>
    %cst_31 = arith.constant 1.000000e+00 : f32
    %88 = vector.broadcast %cst_31 : f32 to vector<8x32xf32>
    %89 = arith.addf %88, %87 : vector<8x32xf32>
    %90 = arith.divf %88, %89 : vector<8x32xf32>
    %91 = vector.extract_strided_slice %84 {offsets = [0, 32], sizes = [8, 32], strides = [1, 1]} : vector<8x128xf32> to vector<8x32xf32>
    %92 = arith.negf %91 : vector<8x32xf32>
    %93 = math.exp %92 : vector<8x32xf32>
    %cst_32 = arith.constant 1.000000e+00 : f32
    %94 = vector.broadcast %cst_32 : f32 to vector<8x32xf32>
    %95 = arith.addf %94, %93 : vector<8x32xf32>
    %96 = arith.divf %94, %95 : vector<8x32xf32>
    %97 = vector.extract_strided_slice %84 {offsets = [0, 64], sizes = [8, 32], strides = [1, 1]} : vector<8x128xf32> to vector<8x32xf32>
    %98 = math.tanh %97 : vector<8x32xf32>
    %99 = vector.extract_strided_slice %84 {offsets = [0, 96], sizes = [8, 32], strides = [1, 1]} : vector<8x128xf32> to vector<8x32xf32>
    %100 = arith.negf %99 : vector<8x32xf32>
    %101 = math.exp %100 : vector<8x32xf32>
    %cst_33 = arith.constant 1.000000e+00 : f32
    %102 = vector.broadcast %cst_33 : f32 to vector<8x32xf32>
    %103 = arith.addf %102, %101 : vector<8x32xf32>
    %104 = arith.divf %102, %103 : vector<8x32xf32>
    %105 = arith.mulf %96, %73 : vector<8x32xf32>
    %106 = arith.mulf %90, %98 : vector<8x32xf32>
    %107 = arith.addf %105, %106 : vector<8x32xf32>
    %108 = math.tanh %107 : vector<8x32xf32>
    %109 = arith.mulf %104, %108 : vector<8x32xf32>
    %110 = arith.index_cast %c2_i32 : i32 to index
    %c0_34 = arith.constant 0 : index
    %c0_35 = arith.constant 0 : index
    %111 = vector.load %arg12[%110, %c0_34, %c0_35] : memref<8x8x32xf32, #tpu.memory_space<vmem>>, vector<1x8x32xf32>
    %112 = vector.shape_cast %111 : vector<1x8x32xf32> to vector<8x32xf32>
    %113 = vector.shape_cast %109 : vector<8x32xf32> to vector<1x8x32xf32>
    tpu.vector_store %arg12[%110, %c0_34, %c0_35], %113 {strides = array<i32>} : memref<8x8x32xf32, #tpu.memory_space<vmem>>, vector<1x8x32xf32>,
    %c3_i32 = arith.constant 3 : i32
    %114 = arith.index_cast %c3_i32 : i32 to index
    %c0_36 = arith.constant 0 : index
    %c0_37 = arith.constant 0 : index
    %115 = vector.load %arg11[%114, %c0_36, %c0_37] : memref<8x8x128xf32, #tpu.memory_space<vmem>>, vector<1x8x128xf32>
    %116 = vector.shape_cast %115 : vector<1x8x128xf32> to vector<8x128xf32>
    %cst_38 = arith.constant dense<0.000000e+00> : vector<8x128xf32>
    %117 = tpu.matmul %109, %9, %cst_38 {dimension_numbers = #tpu.dot_dimension_numbers<[1], [0], [0], [1], [0, 0, 1, 1], [], []>} : vector<8x32xf32>, vector<32x128xf32>, vector<8x128xf32> -> vector<8x128xf32>
    %118 = arith.addf %116, %117 : vector<8x128xf32>
    %119 = vector.extract_strided_slice %118 {offsets = [0, 0], sizes = [8, 32], strides = [1, 1]} : vector<8x128xf32> to vector<8x32xf32>
    %120 = arith.negf %119 : vector<8x32xf32>
    %121 = math.exp %120 : vector<8x32xf32>
    %cst_39 = arith.constant 1.000000e+00 : f32
    %122 = vector.broadcast %cst_39 : f32 to vector<8x32xf32>
    %123 = arith.addf %122, %121 : vector<8x32xf32>
    %124 = arith.divf %122, %123 : vector<8x32xf32>
    %125 = vector.extract_strided_slice %118 {offsets = [0, 32], sizes = [8, 32], strides = [1, 1]} : vector<8x128xf32> to vector<8x32xf32>
    %126 = arith.negf %125 : vector<8x32xf32>
    %127 = math.exp %126 : vector<8x32xf32>
    %cst_40 = arith.constant 1.000000e+00 : f32
    %128 = vector.broadcast %cst_40 : f32 to vector<8x32xf32>
    %129 = arith.addf %128, %127 : vector<8x32xf32>
    %130 = arith.divf %128, %129 : vector<8x32xf32>
    %131 = vector.extract_strided_slice %118 {offsets = [0, 64], sizes = [8, 32], strides = [1, 1]} : vector<8x128xf32> to vector<8x32xf32>
    %132 = math.tanh %131 : vector<8x32xf32>
    %133 = vector.extract_strided_slice %118 {offsets = [0, 96], sizes = [8, 32], strides = [1, 1]} : vector<8x128xf32> to vector<8x32xf32>
    %134 = arith.negf %133 : vector<8x32xf32>
    %135 = math.exp %134 : vector<8x32xf32>
    %cst_41 = arith.constant 1.000000e+00 : f32
    %136 = vector.broadcast %cst_41 : f32 to vector<8x32xf32>
    %137 = arith.addf %136, %135 : vector<8x32xf32>
    %138 = arith.divf %136, %137 : vector<8x32xf32>
    %139 = arith.mulf %130, %107 : vector<8x32xf32>
    %140 = arith.mulf %124, %132 : vector<8x32xf32>
    %141 = arith.addf %139, %140 : vector<8x32xf32>
    %142 = math.tanh %141 : vector<8x32xf32>
    %143 = arith.mulf %138, %142 : vector<8x32xf32>
    %144 = arith.index_cast %c3_i32 : i32 to index
    %c0_42 = arith.constant 0 : index
    %c0_43 = arith.constant 0 : index
    %145 = vector.load %arg12[%144, %c0_42, %c0_43] : memref<8x8x32xf32, #tpu.memory_space<vmem>>, vector<1x8x32xf32>
    %146 = vector.shape_cast %145 : vector<1x8x32xf32> to vector<8x32xf32>
    %147 = vector.shape_cast %143 : vector<8x32xf32> to vector<1x8x32xf32>
    tpu.vector_store %arg12[%144, %c0_42, %c0_43], %147 {strides = array<i32>} : memref<8x8x32xf32, #tpu.memory_space<vmem>>, vector<1x8x32xf32>,
    %c4_i32 = arith.constant 4 : i32
    %148 = arith.index_cast %c4_i32 : i32 to index
    %c0_44 = arith.constant 0 : index
    %c0_45 = arith.constant 0 : index
    %149 = vector.load %arg11[%148, %c0_44, %c0_45] : memref<8x8x128xf32, #tpu.memory_space<vmem>>, vector<1x8x128xf32>
    %150 = vector.shape_cast %149 : vector<1x8x128xf32> to vector<8x128xf32>
    %cst_46 = arith.constant dense<0.000000e+00> : vector<8x128xf32>
    %151 = tpu.matmul %143, %9, %cst_46 {dimension_numbers = #tpu.dot_dimension_numbers<[1], [0], [0], [1], [0, 0, 1, 1], [], []>} : vector<8x32xf32>, vector<32x128xf32>, vector<8x128xf32> -> vector<8x128xf32>
    %152 = arith.addf %150, %151 : vector<8x128xf32>
    %153 = vector.extract_strided_slice %152 {offsets = [0, 0], sizes = [8, 32], strides = [1, 1]} : vector<8x128xf32> to vector<8x32xf32>
    %154 = arith.negf %153 : vector<8x32xf32>
    %155 = math.exp %154 : vector<8x32xf32>
    %cst_47 = arith.constant 1.000000e+00 : f32
    %156 = vector.broadcast %cst_47 : f32 to vector<8x32xf32>
    %157 = arith.addf %156, %155 : vector<8x32xf32>
    %158 = arith.divf %156, %157 : vector<8x32xf32>
    %159 = vector.extract_strided_slice %152 {offsets = [0, 32], sizes = [8, 32], strides = [1, 1]} : vector<8x128xf32> to vector<8x32xf32>
    %160 = arith.negf %159 : vector<8x32xf32>
    %161 = math.exp %160 : vector<8x32xf32>
    %cst_48 = arith.constant 1.000000e+00 : f32
    %162 = vector.broadcast %cst_48 : f32 to vector<8x32xf32>
    %163 = arith.addf %162, %161 : vector<8x32xf32>
    %164 = arith.divf %162, %163 : vector<8x32xf32>
    %165 = vector.extract_strided_slice %152 {offsets = [0, 64], sizes = [8, 32], strides = [1, 1]} : vector<8x128xf32> to vector<8x32xf32>
    %166 = math.tanh %165 : vector<8x32xf32>
    %167 = vector.extract_strided_slice %152 {offsets = [0, 96], sizes = [8, 32], strides = [1, 1]} : vector<8x128xf32> to vector<8x32xf32>
    %168 = arith.negf %167 : vector<8x32xf32>
    %169 = math.exp %168 : vector<8x32xf32>
    %cst_49 = arith.constant 1.000000e+00 : f32
    %170 = vector.broadcast %cst_49 : f32 to vector<8x32xf32>
    %171 = arith.addf %170, %169 : vector<8x32xf32>
    %172 = arith.divf %170, %171 : vector<8x32xf32>
    %173 = arith.mulf %164, %141 : vector<8x32xf32>
    %174 = arith.mulf %158, %166 : vector<8x32xf32>
    %175 = arith.addf %173, %174 : vector<8x32xf32>
    %176 = math.tanh %175 : vector<8x32xf32>
    %177 = arith.mulf %172, %176 : vector<8x32xf32>
    %178 = arith.index_cast %c4_i32 : i32 to index
    %c0_50 = arith.constant 0 : index
    %c0_51 = arith.constant 0 : index
    %179 = vector.load %arg12[%178, %c0_50, %c0_51] : memref<8x8x32xf32, #tpu.memory_space<vmem>>, vector<1x8x32xf32>
    %180 = vector.shape_cast %179 : vector<1x8x32xf32> to vector<8x32xf32>
    %181 = vector.shape_cast %177 : vector<8x32xf32> to vector<1x8x32xf32>
    tpu.vector_store %arg12[%178, %c0_50, %c0_51], %181 {strides = array<i32>} : memref<8x8x32xf32, #tpu.memory_space<vmem>>, vector<1x8x32xf32>,
    %c5_i32 = arith.constant 5 : i32
    %182 = arith.index_cast %c5_i32 : i32 to index
    %c0_52 = arith.constant 0 : index
    %c0_53 = arith.constant 0 : index
    %183 = vector.load %arg11[%182, %c0_52, %c0_53] : memref<8x8x128xf32, #tpu.memory_space<vmem>>, vector<1x8x128xf32>
    %184 = vector.shape_cast %183 : vector<1x8x128xf32> to vector<8x128xf32>
    %cst_54 = arith.constant dense<0.000000e+00> : vector<8x128xf32>
    %185 = tpu.matmul %177, %9, %cst_54 {dimension_numbers = #tpu.dot_dimension_numbers<[1], [0], [0], [1], [0, 0, 1, 1], [], []>} : vector<8x32xf32>, vector<32x128xf32>, vector<8x128xf32> -> vector<8x128xf32>
    %186 = arith.addf %184, %185 : vector<8x128xf32>
    %187 = vector.extract_strided_slice %186 {offsets = [0, 0], sizes = [8, 32], strides = [1, 1]} : vector<8x128xf32> to vector<8x32xf32>
    %188 = arith.negf %187 : vector<8x32xf32>
    %189 = math.exp %188 : vector<8x32xf32>
    %cst_55 = arith.constant 1.000000e+00 : f32
    %190 = vector.broadcast %cst_55 : f32 to vector<8x32xf32>
    %191 = arith.addf %190, %189 : vector<8x32xf32>
    %192 = arith.divf %190, %191 : vector<8x32xf32>
    %193 = vector.extract_strided_slice %186 {offsets = [0, 32], sizes = [8, 32], strides = [1, 1]} : vector<8x128xf32> to vector<8x32xf32>
    %194 = arith.negf %193 : vector<8x32xf32>
    %195 = math.exp %194 : vector<8x32xf32>
    %cst_56 = arith.constant 1.000000e+00 : f32
    %196 = vector.broadcast %cst_56 : f32 to vector<8x32xf32>
    %197 = arith.addf %196, %195 : vector<8x32xf32>
    %198 = arith.divf %196, %197 : vector<8x32xf32>
    %199 = vector.extract_strided_slice %186 {offsets = [0, 64], sizes = [8, 32], strides = [1, 1]} : vector<8x128xf32> to vector<8x32xf32>
    %200 = math.tanh %199 : vector<8x32xf32>
    %201 = vector.extract_strided_slice %186 {offsets = [0, 96], sizes = [8, 32], strides = [1, 1]} : vector<8x128xf32> to vector<8x32xf32>
    %202 = arith.negf %201 : vector<8x32xf32>
    %203 = math.exp %202 : vector<8x32xf32>
    %cst_57 = arith.constant 1.000000e+00 : f32
    %204 = vector.broadcast %cst_57 : f32 to vector<8x32xf32>
    %205 = arith.addf %204, %203 : vector<8x32xf32>
    %206 = arith.divf %204, %205 : vector<8x32xf32>
    %207 = arith.mulf %198, %175 : vector<8x32xf32>
    %208 = arith.mulf %192, %200 : vector<8x32xf32>
    %209 = arith.addf %207, %208 : vector<8x32xf32>
    %210 = math.tanh %209 : vector<8x32xf32>
    %211 = arith.mulf %206, %210 : vector<8x32xf32>
    %212 = arith.index_cast %c5_i32 : i32 to index
    %c0_58 = arith.constant 0 : index
    %c0_59 = arith.constant 0 : index
    %213 = vector.load %arg12[%212, %c0_58, %c0_59] : memref<8x8x32xf32, #tpu.memory_space<vmem>>, vector<1x8x32xf32>
    %214 = vector.shape_cast %213 : vector<1x8x32xf32> to vector<8x32xf32>
    %215 = vector.shape_cast %211 : vector<8x32xf32> to vector<1x8x32xf32>
    tpu.vector_store %arg12[%212, %c0_58, %c0_59], %215 {strides = array<i32>} : memref<8x8x32xf32, #tpu.memory_space<vmem>>, vector<1x8x32xf32>,
    %c6_i32 = arith.constant 6 : i32
    %216 = arith.index_cast %c6_i32 : i32 to index
    %c0_60 = arith.constant 0 : index
    %c0_61 = arith.constant 0 : index
    %217 = vector.load %arg11[%216, %c0_60, %c0_61] : memref<8x8x128xf32, #tpu.memory_space<vmem>>, vector<1x8x128xf32>
    %218 = vector.shape_cast %217 : vector<1x8x128xf32> to vector<8x128xf32>
    %cst_62 = arith.constant dense<0.000000e+00> : vector<8x128xf32>
    %219 = tpu.matmul %211, %9, %cst_62 {dimension_numbers = #tpu.dot_dimension_numbers<[1], [0], [0], [1], [0, 0, 1, 1], [], []>} : vector<8x32xf32>, vector<32x128xf32>, vector<8x128xf32> -> vector<8x128xf32>
    %220 = arith.addf %218, %219 : vector<8x128xf32>
    %221 = vector.extract_strided_slice %220 {offsets = [0, 0], sizes = [8, 32], strides = [1, 1]} : vector<8x128xf32> to vector<8x32xf32>
    %222 = arith.negf %221 : vector<8x32xf32>
    %223 = math.exp %222 : vector<8x32xf32>
    %cst_63 = arith.constant 1.000000e+00 : f32
    %224 = vector.broadcast %cst_63 : f32 to vector<8x32xf32>
    %225 = arith.addf %224, %223 : vector<8x32xf32>
    %226 = arith.divf %224, %225 : vector<8x32xf32>
    %227 = vector.extract_strided_slice %220 {offsets = [0, 32], sizes = [8, 32], strides = [1, 1]} : vector<8x128xf32> to vector<8x32xf32>
    %228 = arith.negf %227 : vector<8x32xf32>
    %229 = math.exp %228 : vector<8x32xf32>
    %cst_64 = arith.constant 1.000000e+00 : f32
    %230 = vector.broadcast %cst_64 : f32 to vector<8x32xf32>
    %231 = arith.addf %230, %229 : vector<8x32xf32>
    %232 = arith.divf %230, %231 : vector<8x32xf32>
    %233 = vector.extract_strided_slice %220 {offsets = [0, 64], sizes = [8, 32], strides = [1, 1]} : vector<8x128xf32> to vector<8x32xf32>
    %234 = math.tanh %233 : vector<8x32xf32>
    %235 = vector.extract_strided_slice %220 {offsets = [0, 96], sizes = [8, 32], strides = [1, 1]} : vector<8x128xf32> to vector<8x32xf32>
    %236 = arith.negf %235 : vector<8x32xf32>
    %237 = math.exp %236 : vector<8x32xf32>
    %cst_65 = arith.constant 1.000000e+00 : f32
    %238 = vector.broadcast %cst_65 : f32 to vector<8x32xf32>
    %239 = arith.addf %238, %237 : vector<8x32xf32>
    %240 = arith.divf %238, %239 : vector<8x32xf32>
    %241 = arith.mulf %232, %209 : vector<8x32xf32>
    %242 = arith.mulf %226, %234 : vector<8x32xf32>
    %243 = arith.addf %241, %242 : vector<8x32xf32>
    %244 = math.tanh %243 : vector<8x32xf32>
    %245 = arith.mulf %240, %244 : vector<8x32xf32>
    %246 = arith.index_cast %c6_i32 : i32 to index
    %c0_66 = arith.constant 0 : index
    %c0_67 = arith.constant 0 : index
    %247 = vector.load %arg12[%246, %c0_66, %c0_67] : memref<8x8x32xf32, #tpu.memory_space<vmem>>, vector<1x8x32xf32>
    %248 = vector.shape_cast %247 : vector<1x8x32xf32> to vector<8x32xf32>
    %249 = vector.shape_cast %245 : vector<8x32xf32> to vector<1x8x32xf32>
    tpu.vector_store %arg12[%246, %c0_66, %c0_67], %249 {strides = array<i32>} : memref<8x8x32xf32, #tpu.memory_space<vmem>>, vector<1x8x32xf32>,
    %c7_i32 = arith.constant 7 : i32
    %250 = arith.index_cast %c7_i32 : i32 to index
    %c0_68 = arith.constant 0 : index
    %c0_69 = arith.constant 0 : index
    %251 = vector.load %arg11[%250, %c0_68, %c0_69] : memref<8x8x128xf32, #tpu.memory_space<vmem>>, vector<1x8x128xf32>
    %252 = vector.shape_cast %251 : vector<1x8x128xf32> to vector<8x128xf32>
    %cst_70 = arith.constant dense<0.000000e+00> : vector<8x128xf32>
    %253 = tpu.matmul %245, %9, %cst_70 {dimension_numbers = #tpu.dot_dimension_numbers<[1], [0], [0], [1], [0, 0, 1, 1], [], []>} : vector<8x32xf32>, vector<32x128xf32>, vector<8x128xf32> -> vector<8x128xf32>
    %254 = arith.addf %252, %253 : vector<8x128xf32>
    %255 = vector.extract_strided_slice %254 {offsets = [0, 0], sizes = [8, 32], strides = [1, 1]} : vector<8x128xf32> to vector<8x32xf32>
    %256 = arith.negf %255 : vector<8x32xf32>
    %257 = math.exp %256 : vector<8x32xf32>
    %cst_71 = arith.constant 1.000000e+00 : f32
    %258 = vector.broadcast %cst_71 : f32 to vector<8x32xf32>
    %259 = arith.addf %258, %257 : vector<8x32xf32>
    %260 = arith.divf %258, %259 : vector<8x32xf32>
    %261 = vector.extract_strided_slice %254 {offsets = [0, 32], sizes = [8, 32], strides = [1, 1]} : vector<8x128xf32> to vector<8x32xf32>
    %262 = arith.negf %261 : vector<8x32xf32>
    %263 = math.exp %262 : vector<8x32xf32>
    %cst_72 = arith.constant 1.000000e+00 : f32
    %264 = vector.broadcast %cst_72 : f32 to vector<8x32xf32>
    %265 = arith.addf %264, %263 : vector<8x32xf32>
    %266 = arith.divf %264, %265 : vector<8x32xf32>
    %267 = vector.extract_strided_slice %254 {offsets = [0, 64], sizes = [8, 32], strides = [1, 1]} : vector<8x128xf32> to vector<8x32xf32>
    %268 = math.tanh %267 : vector<8x32xf32>
    %269 = vector.extract_strided_slice %254 {offsets = [0, 96], sizes = [8, 32], strides = [1, 1]} : vector<8x128xf32> to vector<8x32xf32>
    %270 = arith.negf %269 : vector<8x32xf32>
    %271 = math.exp %270 : vector<8x32xf32>
    %cst_73 = arith.constant 1.000000e+00 : f32
    %272 = vector.broadcast %cst_73 : f32 to vector<8x32xf32>
    %273 = arith.addf %272, %271 : vector<8x32xf32>
    %274 = arith.divf %272, %273 : vector<8x32xf32>
    %275 = arith.mulf %266, %243 : vector<8x32xf32>
    %276 = arith.mulf %260, %268 : vector<8x32xf32>
    %277 = arith.addf %275, %276 : vector<8x32xf32>
    %278 = math.tanh %277 : vector<8x32xf32>
    %279 = arith.mulf %274, %278 : vector<8x32xf32>
    %280 = arith.index_cast %c7_i32 : i32 to index
    %c0_74 = arith.constant 0 : index
    %c0_75 = arith.constant 0 : index
    %281 = vector.load %arg12[%280, %c0_74, %c0_75] : memref<8x8x32xf32, #tpu.memory_space<vmem>>, vector<1x8x32xf32>
    %282 = vector.shape_cast %281 : vector<1x8x32xf32> to vector<8x32xf32>
    %283 = vector.shape_cast %279 : vector<8x32xf32> to vector<1x8x32xf32>
    tpu.vector_store %arg12[%280, %c0_74, %c0_75], %283 {strides = array<i32>} : memref<8x8x32xf32, #tpu.memory_space<vmem>>, vector<1x8x32xf32>,
    %c8_i32 = arith.constant 8 : i32
    %c0_76 = arith.constant 0 : index
    %c0_77 = arith.constant 0 : index
    %c0_78 = arith.constant 0 : index
    %284 = vector.load %arg12[%c0_76, %c0_77, %c0_78] : memref<8x8x32xf32, #tpu.memory_space<vmem>>, vector<8x8x32xf32>
    %285 = vector.shape_cast %284 : vector<8x8x32xf32> to vector<64x32xf32>
    %c0_79 = arith.constant 0 : index
    %c0_80 = arith.constant 0 : index
    %286 = vector.load %arg5[%c0_79, %c0_80] : memref<32x128xf32, #tpu.memory_space<vmem>>, vector<32x128xf32>
    %cst_81 = arith.constant dense<0.000000e+00> : vector<64x128xf32>
    %287 = tpu.matmul %285, %286, %cst_81 {dimension_numbers = #tpu.dot_dimension_numbers<[1], [0], [0], [1], [0, 0, 1, 1], [], []>} : vector<64x32xf32>, vector<32x128xf32>, vector<64x128xf32> -> vector<64x128xf32>
    %288 = vector.shape_cast %287 : vector<64x128xf32> to vector<8x8x128xf32>
    %c0_82 = arith.constant 0 : index
    %c0_83 = arith.constant 0 : index
    %289 = vector.load %arg7[%c0_82, %c0_83] : memref<1x128xf32, #tpu.memory_space<vmem>>, vector<1x128xf32>
    %290 = vector.shape_cast %289 : vector<1x128xf32> to vector<1x1x128xf32>
    %291 = vector.broadcast %290 : vector<1x1x128xf32> to vector<8x8x128xf32>
    %292 = arith.addf %288, %291 : vector<8x8x128xf32>
    %c0_84 = arith.constant 0 : index
    %c0_85 = arith.constant 0 : index
    %c0_86 = arith.constant 0 : index
    %293 = vector.load %arg13[%c0_84, %c0_85, %c0_86] : memref<8x8x128xf32, #tpu.memory_space<vmem>>, vector<8x8x128xf32>
    tpu.vector_store %arg13[%c0_84, %c0_85, %c0_86], %292 {strides = array<i32>} : memref<8x8x128xf32, #tpu.memory_space<vmem>>, vector<8x8x128xf32>,
    %c0_87 = arith.constant 0 : index
    %c0_88 = arith.constant 0 : index
    %294 = vector.load %arg6[%c0_87, %c0_88] : memref<32x128xf32, #tpu.memory_space<vmem>>, vector<32x128xf32>
    %cst_89 = arith.constant 0.000000e+00 : f32
    %295 = vector.broadcast %cst_89 : f32 to vector<8x32xf32>
    %cst_90 = arith.constant 0.000000e+00 : f32
    %296 = vector.broadcast %cst_90 : f32 to vector<8x32xf32>
    %c0_i32_91 = arith.constant 0 : i32
    %297 = arith.index_cast %c0_i32_91 : i32 to index
    %c0_92 = arith.constant 0 : index
    %c0_93 = arith.constant 0 : index
    %298 = vector.load %arg13[%297, %c0_92, %c0_93] : memref<8x8x128xf32, #tpu.memory_space<vmem>>, vector<1x8x128xf32>
    %299 = vector.shape_cast %298 : vector<1x8x128xf32> to vector<8x128xf32>
    %cst_94 = arith.constant dense<0.000000e+00> : vector<8x128xf32>
    %300 = tpu.matmul %295, %294, %cst_94 {dimension_numbers = #tpu.dot_dimension_numbers<[1], [0], [0], [1], [0, 0, 1, 1], [], []>} : vector<8x32xf32>, vector<32x128xf32>, vector<8x128xf32> -> vector<8x128xf32>
    %301 = arith.addf %299, %300 : vector<8x128xf32>
    %302 = vector.extract_strided_slice %301 {offsets = [0, 0], sizes = [8, 32], strides = [1, 1]} : vector<8x128xf32> to vector<8x32xf32>
    %303 = arith.negf %302 : vector<8x32xf32>
    %304 = math.exp %303 : vector<8x32xf32>
    %cst_95 = arith.constant 1.000000e+00 : f32
    %305 = vector.broadcast %cst_95 : f32 to vector<8x32xf32>
    %306 = arith.addf %305, %304 : vector<8x32xf32>
    %307 = arith.divf %305, %306 : vector<8x32xf32>
    %308 = vector.extract_strided_slice %301 {offsets = [0, 32], sizes = [8, 32], strides = [1, 1]} : vector<8x128xf32> to vector<8x32xf32>
    %309 = arith.negf %308 : vector<8x32xf32>
    %310 = math.exp %309 : vector<8x32xf32>
    %cst_96 = arith.constant 1.000000e+00 : f32
    %311 = vector.broadcast %cst_96 : f32 to vector<8x32xf32>
    %312 = arith.addf %311, %310 : vector<8x32xf32>
    %313 = arith.divf %311, %312 : vector<8x32xf32>
    %314 = vector.extract_strided_slice %301 {offsets = [0, 64], sizes = [8, 32], strides = [1, 1]} : vector<8x128xf32> to vector<8x32xf32>
    %315 = math.tanh %314 : vector<8x32xf32>
    %316 = vector.extract_strided_slice %301 {offsets = [0, 96], sizes = [8, 32], strides = [1, 1]} : vector<8x128xf32> to vector<8x32xf32>
    %317 = arith.negf %316 : vector<8x32xf32>
    %318 = math.exp %317 : vector<8x32xf32>
    %cst_97 = arith.constant 1.000000e+00 : f32
    %319 = vector.broadcast %cst_97 : f32 to vector<8x32xf32>
    %320 = arith.addf %319, %318 : vector<8x32xf32>
    %321 = arith.divf %319, %320 : vector<8x32xf32>
    %322 = arith.mulf %313, %296 : vector<8x32xf32>
    %323 = arith.mulf %307, %315 : vector<8x32xf32>
    %324 = arith.addf %322, %323 : vector<8x32xf32>
    %325 = math.tanh %324 : vector<8x32xf32>
    %326 = arith.mulf %321, %325 : vector<8x32xf32>
    %c1_i32_98 = arith.constant 1 : i32
    %327 = arith.index_cast %c1_i32_98 : i32 to index
    %c0_99 = arith.constant 0 : index
    %c0_100 = arith.constant 0 : index
    %328 = vector.load %arg13[%327, %c0_99, %c0_100] : memref<8x8x128xf32, #tpu.memory_space<vmem>>, vector<1x8x128xf32>
    %329 = vector.shape_cast %328 : vector<1x8x128xf32> to vector<8x128xf32>
    %cst_101 = arith.constant dense<0.000000e+00> : vector<8x128xf32>
    %330 = tpu.matmul %326, %294, %cst_101 {dimension_numbers = #tpu.dot_dimension_numbers<[1], [0], [0], [1], [0, 0, 1, 1], [], []>} : vector<8x32xf32>, vector<32x128xf32>, vector<8x128xf32> -> vector<8x128xf32>
    %331 = arith.addf %329, %330 : vector<8x128xf32>
    %332 = vector.extract_strided_slice %331 {offsets = [0, 0], sizes = [8, 32], strides = [1, 1]} : vector<8x128xf32> to vector<8x32xf32>
    %333 = arith.negf %332 : vector<8x32xf32>
    %334 = math.exp %333 : vector<8x32xf32>
    %cst_102 = arith.constant 1.000000e+00 : f32
    %335 = vector.broadcast %cst_102 : f32 to vector<8x32xf32>
    %336 = arith.addf %335, %334 : vector<8x32xf32>
    %337 = arith.divf %335, %336 : vector<8x32xf32>
    %338 = vector.extract_strided_slice %331 {offsets = [0, 32], sizes = [8, 32], strides = [1, 1]} : vector<8x128xf32> to vector<8x32xf32>
    %339 = arith.negf %338 : vector<8x32xf32>
    %340 = math.exp %339 : vector<8x32xf32>
    %cst_103 = arith.constant 1.000000e+00 : f32
    %341 = vector.broadcast %cst_103 : f32 to vector<8x32xf32>
    %342 = arith.addf %341, %340 : vector<8x32xf32>
    %343 = arith.divf %341, %342 : vector<8x32xf32>
    %344 = vector.extract_strided_slice %331 {offsets = [0, 64], sizes = [8, 32], strides = [1, 1]} : vector<8x128xf32> to vector<8x32xf32>
    %345 = math.tanh %344 : vector<8x32xf32>
    %346 = vector.extract_strided_slice %331 {offsets = [0, 96], sizes = [8, 32], strides = [1, 1]} : vector<8x128xf32> to vector<8x32xf32>
    %347 = arith.negf %346 : vector<8x32xf32>
    %348 = math.exp %347 : vector<8x32xf32>
    %cst_104 = arith.constant 1.000000e+00 : f32
    %349 = vector.broadcast %cst_104 : f32 to vector<8x32xf32>
    %350 = arith.addf %349, %348 : vector<8x32xf32>
    %351 = arith.divf %349, %350 : vector<8x32xf32>
    %352 = arith.mulf %343, %324 : vector<8x32xf32>
    %353 = arith.mulf %337, %345 : vector<8x32xf32>
    %354 = arith.addf %352, %353 : vector<8x32xf32>
    %355 = math.tanh %354 : vector<8x32xf32>
    %356 = arith.mulf %351, %355 : vector<8x32xf32>
    %c2_i32_105 = arith.constant 2 : i32
    %357 = arith.index_cast %c2_i32_105 : i32 to index
    %c0_106 = arith.constant 0 : index
    %c0_107 = arith.constant 0 : index
    %358 = vector.load %arg13[%357, %c0_106, %c0_107] : memref<8x8x128xf32, #tpu.memory_space<vmem>>, vector<1x8x128xf32>
    %359 = vector.shape_cast %358 : vector<1x8x128xf32> to vector<8x128xf32>
    %cst_108 = arith.constant dense<0.000000e+00> : vector<8x128xf32>
    %360 = tpu.matmul %356, %294, %cst_108 {dimension_numbers = #tpu.dot_dimension_numbers<[1], [0], [0], [1], [0, 0, 1, 1], [], []>} : vector<8x32xf32>, vector<32x128xf32>, vector<8x128xf32> -> vector<8x128xf32>
    %361 = arith.addf %359, %360 : vector<8x128xf32>
    %362 = vector.extract_strided_slice %361 {offsets = [0, 0], sizes = [8, 32], strides = [1, 1]} : vector<8x128xf32> to vector<8x32xf32>
    %363 = arith.negf %362 : vector<8x32xf32>
    %364 = math.exp %363 : vector<8x32xf32>
    %cst_109 = arith.constant 1.000000e+00 : f32
    %365 = vector.broadcast %cst_109 : f32 to vector<8x32xf32>
    %366 = arith.addf %365, %364 : vector<8x32xf32>
    %367 = arith.divf %365, %366 : vector<8x32xf32>
    %368 = vector.extract_strided_slice %361 {offsets = [0, 32], sizes = [8, 32], strides = [1, 1]} : vector<8x128xf32> to vector<8x32xf32>
    %369 = arith.negf %368 : vector<8x32xf32>
    %370 = math.exp %369 : vector<8x32xf32>
    %cst_110 = arith.constant 1.000000e+00 : f32
    %371 = vector.broadcast %cst_110 : f32 to vector<8x32xf32>
    %372 = arith.addf %371, %370 : vector<8x32xf32>
    %373 = arith.divf %371, %372 : vector<8x32xf32>
    %374 = vector.extract_strided_slice %361 {offsets = [0, 64], sizes = [8, 32], strides = [1, 1]} : vector<8x128xf32> to vector<8x32xf32>
    %375 = math.tanh %374 : vector<8x32xf32>
    %376 = vector.extract_strided_slice %361 {offsets = [0, 96], sizes = [8, 32], strides = [1, 1]} : vector<8x128xf32> to vector<8x32xf32>
    %377 = arith.negf %376 : vector<8x32xf32>
    %378 = math.exp %377 : vector<8x32xf32>
    %cst_111 = arith.constant 1.000000e+00 : f32
    %379 = vector.broadcast %cst_111 : f32 to vector<8x32xf32>
    %380 = arith.addf %379, %378 : vector<8x32xf32>
    %381 = arith.divf %379, %380 : vector<8x32xf32>
    %382 = arith.mulf %373, %354 : vector<8x32xf32>
    %383 = arith.mulf %367, %375 : vector<8x32xf32>
    %384 = arith.addf %382, %383 : vector<8x32xf32>
    %385 = math.tanh %384 : vector<8x32xf32>
    %386 = arith.mulf %381, %385 : vector<8x32xf32>
    %c3_i32_112 = arith.constant 3 : i32
    %387 = arith.index_cast %c3_i32_112 : i32 to index
    %c0_113 = arith.constant 0 : index
    %c0_114 = arith.constant 0 : index
    %388 = vector.load %arg13[%387, %c0_113, %c0_114] : memref<8x8x128xf32, #tpu.memory_space<vmem>>, vector<1x8x128xf32>
    %389 = vector.shape_cast %388 : vector<1x8x128xf32> to vector<8x128xf32>
    %cst_115 = arith.constant dense<0.000000e+00> : vector<8x128xf32>
    %390 = tpu.matmul %386, %294, %cst_115 {dimension_numbers = #tpu.dot_dimension_numbers<[1], [0], [0], [1], [0, 0, 1, 1], [], []>} : vector<8x32xf32>, vector<32x128xf32>, vector<8x128xf32> -> vector<8x128xf32>
    %391 = arith.addf %389, %390 : vector<8x128xf32>
    %392 = vector.extract_strided_slice %391 {offsets = [0, 0], sizes = [8, 32], strides = [1, 1]} : vector<8x128xf32> to vector<8x32xf32>
    %393 = arith.negf %392 : vector<8x32xf32>
    %394 = math.exp %393 : vector<8x32xf32>
    %cst_116 = arith.constant 1.000000e+00 : f32
    %395 = vector.broadcast %cst_116 : f32 to vector<8x32xf32>
    %396 = arith.addf %395, %394 : vector<8x32xf32>
    %397 = arith.divf %395, %396 : vector<8x32xf32>
    %398 = vector.extract_strided_slice %391 {offsets = [0, 32], sizes = [8, 32], strides = [1, 1]} : vector<8x128xf32> to vector<8x32xf32>
    %399 = arith.negf %398 : vector<8x32xf32>
    %400 = math.exp %399 : vector<8x32xf32>
    %cst_117 = arith.constant 1.000000e+00 : f32
    %401 = vector.broadcast %cst_117 : f32 to vector<8x32xf32>
    %402 = arith.addf %401, %400 : vector<8x32xf32>
    %403 = arith.divf %401, %402 : vector<8x32xf32>
    %404 = vector.extract_strided_slice %391 {offsets = [0, 64], sizes = [8, 32], strides = [1, 1]} : vector<8x128xf32> to vector<8x32xf32>
    %405 = math.tanh %404 : vector<8x32xf32>
    %406 = vector.extract_strided_slice %391 {offsets = [0, 96], sizes = [8, 32], strides = [1, 1]} : vector<8x128xf32> to vector<8x32xf32>
    %407 = arith.negf %406 : vector<8x32xf32>
    %408 = math.exp %407 : vector<8x32xf32>
    %cst_118 = arith.constant 1.000000e+00 : f32
    %409 = vector.broadcast %cst_118 : f32 to vector<8x32xf32>
    %410 = arith.addf %409, %408 : vector<8x32xf32>
    %411 = arith.divf %409, %410 : vector<8x32xf32>
    %412 = arith.mulf %403, %384 : vector<8x32xf32>
    %413 = arith.mulf %397, %405 : vector<8x32xf32>
    %414 = arith.addf %412, %413 : vector<8x32xf32>
    %415 = math.tanh %414 : vector<8x32xf32>
    %416 = arith.mulf %411, %415 : vector<8x32xf32>
    %c4_i32_119 = arith.constant 4 : i32
    %417 = arith.index_cast %c4_i32_119 : i32 to index
    %c0_120 = arith.constant 0 : index
    %c0_121 = arith.constant 0 : index
    %418 = vector.load %arg13[%417, %c0_120, %c0_121] : memref<8x8x128xf32, #tpu.memory_space<vmem>>, vector<1x8x128xf32>
    %419 = vector.shape_cast %418 : vector<1x8x128xf32> to vector<8x128xf32>
    %cst_122 = arith.constant dense<0.000000e+00> : vector<8x128xf32>
    %420 = tpu.matmul %416, %294, %cst_122 {dimension_numbers = #tpu.dot_dimension_numbers<[1], [0], [0], [1], [0, 0, 1, 1], [], []>} : vector<8x32xf32>, vector<32x128xf32>, vector<8x128xf32> -> vector<8x128xf32>
    %421 = arith.addf %419, %420 : vector<8x128xf32>
    %422 = vector.extract_strided_slice %421 {offsets = [0, 0], sizes = [8, 32], strides = [1, 1]} : vector<8x128xf32> to vector<8x32xf32>
    %423 = arith.negf %422 : vector<8x32xf32>
    %424 = math.exp %423 : vector<8x32xf32>
    %cst_123 = arith.constant 1.000000e+00 : f32
    %425 = vector.broadcast %cst_123 : f32 to vector<8x32xf32>
    %426 = arith.addf %425, %424 : vector<8x32xf32>
    %427 = arith.divf %425, %426 : vector<8x32xf32>
    %428 = vector.extract_strided_slice %421 {offsets = [0, 32], sizes = [8, 32], strides = [1, 1]} : vector<8x128xf32> to vector<8x32xf32>
    %429 = arith.negf %428 : vector<8x32xf32>
    %430 = math.exp %429 : vector<8x32xf32>
    %cst_124 = arith.constant 1.000000e+00 : f32
    %431 = vector.broadcast %cst_124 : f32 to vector<8x32xf32>
    %432 = arith.addf %431, %430 : vector<8x32xf32>
    %433 = arith.divf %431, %432 : vector<8x32xf32>
    %434 = vector.extract_strided_slice %421 {offsets = [0, 64], sizes = [8, 32], strides = [1, 1]} : vector<8x128xf32> to vector<8x32xf32>
    %435 = math.tanh %434 : vector<8x32xf32>
    %436 = vector.extract_strided_slice %421 {offsets = [0, 96], sizes = [8, 32], strides = [1, 1]} : vector<8x128xf32> to vector<8x32xf32>
    %437 = arith.negf %436 : vector<8x32xf32>
    %438 = math.exp %437 : vector<8x32xf32>
    %cst_125 = arith.constant 1.000000e+00 : f32
    %439 = vector.broadcast %cst_125 : f32 to vector<8x32xf32>
    %440 = arith.addf %439, %438 : vector<8x32xf32>
    %441 = arith.divf %439, %440 : vector<8x32xf32>
    %442 = arith.mulf %433, %414 : vector<8x32xf32>
    %443 = arith.mulf %427, %435 : vector<8x32xf32>
    %444 = arith.addf %442, %443 : vector<8x32xf32>
    %445 = math.tanh %444 : vector<8x32xf32>
    %446 = arith.mulf %441, %445 : vector<8x32xf32>
    %c5_i32_126 = arith.constant 5 : i32
    %447 = arith.index_cast %c5_i32_126 : i32 to index
    %c0_127 = arith.constant 0 : index
    %c0_128 = arith.constant 0 : index
    %448 = vector.load %arg13[%447, %c0_127, %c0_128] : memref<8x8x128xf32, #tpu.memory_space<vmem>>, vector<1x8x128xf32>
    %449 = vector.shape_cast %448 : vector<1x8x128xf32> to vector<8x128xf32>
    %cst_129 = arith.constant dense<0.000000e+00> : vector<8x128xf32>
    %450 = tpu.matmul %446, %294, %cst_129 {dimension_numbers = #tpu.dot_dimension_numbers<[1], [0], [0], [1], [0, 0, 1, 1], [], []>} : vector<8x32xf32>, vector<32x128xf32>, vector<8x128xf32> -> vector<8x128xf32>
    %451 = arith.addf %449, %450 : vector<8x128xf32>
    %452 = vector.extract_strided_slice %451 {offsets = [0, 0], sizes = [8, 32], strides = [1, 1]} : vector<8x128xf32> to vector<8x32xf32>
    %453 = arith.negf %452 : vector<8x32xf32>
    %454 = math.exp %453 : vector<8x32xf32>
    %cst_130 = arith.constant 1.000000e+00 : f32
    %455 = vector.broadcast %cst_130 : f32 to vector<8x32xf32>
    %456 = arith.addf %455, %454 : vector<8x32xf32>
    %457 = arith.divf %455, %456 : vector<8x32xf32>
    %458 = vector.extract_strided_slice %451 {offsets = [0, 32], sizes = [8, 32], strides = [1, 1]} : vector<8x128xf32> to vector<8x32xf32>
    %459 = arith.negf %458 : vector<8x32xf32>
    %460 = math.exp %459 : vector<8x32xf32>
    %cst_131 = arith.constant 1.000000e+00 : f32
    %461 = vector.broadcast %cst_131 : f32 to vector<8x32xf32>
    %462 = arith.addf %461, %460 : vector<8x32xf32>
    %463 = arith.divf %461, %462 : vector<8x32xf32>
    %464 = vector.extract_strided_slice %451 {offsets = [0, 64], sizes = [8, 32], strides = [1, 1]} : vector<8x128xf32> to vector<8x32xf32>
    %465 = math.tanh %464 : vector<8x32xf32>
    %466 = vector.extract_strided_slice %451 {offsets = [0, 96], sizes = [8, 32], strides = [1, 1]} : vector<8x128xf32> to vector<8x32xf32>
    %467 = arith.negf %466 : vector<8x32xf32>
    %468 = math.exp %467 : vector<8x32xf32>
    %cst_132 = arith.constant 1.000000e+00 : f32
    %469 = vector.broadcast %cst_132 : f32 to vector<8x32xf32>
    %470 = arith.addf %469, %468 : vector<8x32xf32>
    %471 = arith.divf %469, %470 : vector<8x32xf32>
    %472 = arith.mulf %463, %444 : vector<8x32xf32>
    %473 = arith.mulf %457, %465 : vector<8x32xf32>
    %474 = arith.addf %472, %473 : vector<8x32xf32>
    %475 = math.tanh %474 : vector<8x32xf32>
    %476 = arith.mulf %471, %475 : vector<8x32xf32>
    %c6_i32_133 = arith.constant 6 : i32
    %477 = arith.index_cast %c6_i32_133 : i32 to index
    %c0_134 = arith.constant 0 : index
    %c0_135 = arith.constant 0 : index
    %478 = vector.load %arg13[%477, %c0_134, %c0_135] : memref<8x8x128xf32, #tpu.memory_space<vmem>>, vector<1x8x128xf32>
    %479 = vector.shape_cast %478 : vector<1x8x128xf32> to vector<8x128xf32>
    %cst_136 = arith.constant dense<0.000000e+00> : vector<8x128xf32>
    %480 = tpu.matmul %476, %294, %cst_136 {dimension_numbers = #tpu.dot_dimension_numbers<[1], [0], [0], [1], [0, 0, 1, 1], [], []>} : vector<8x32xf32>, vector<32x128xf32>, vector<8x128xf32> -> vector<8x128xf32>
    %481 = arith.addf %479, %480 : vector<8x128xf32>
    %482 = vector.extract_strided_slice %481 {offsets = [0, 0], sizes = [8, 32], strides = [1, 1]} : vector<8x128xf32> to vector<8x32xf32>
    %483 = arith.negf %482 : vector<8x32xf32>
    %484 = math.exp %483 : vector<8x32xf32>
    %cst_137 = arith.constant 1.000000e+00 : f32
    %485 = vector.broadcast %cst_137 : f32 to vector<8x32xf32>
    %486 = arith.addf %485, %484 : vector<8x32xf32>
    %487 = arith.divf %485, %486 : vector<8x32xf32>
    %488 = vector.extract_strided_slice %481 {offsets = [0, 32], sizes = [8, 32], strides = [1, 1]} : vector<8x128xf32> to vector<8x32xf32>
    %489 = arith.negf %488 : vector<8x32xf32>
    %490 = math.exp %489 : vector<8x32xf32>
    %cst_138 = arith.constant 1.000000e+00 : f32
    %491 = vector.broadcast %cst_138 : f32 to vector<8x32xf32>
    %492 = arith.addf %491, %490 : vector<8x32xf32>
    %493 = arith.divf %491, %492 : vector<8x32xf32>
    %494 = vector.extract_strided_slice %481 {offsets = [0, 64], sizes = [8, 32], strides = [1, 1]} : vector<8x128xf32> to vector<8x32xf32>
    %495 = math.tanh %494 : vector<8x32xf32>
    %496 = vector.extract_strided_slice %481 {offsets = [0, 96], sizes = [8, 32], strides = [1, 1]} : vector<8x128xf32> to vector<8x32xf32>
    %497 = arith.negf %496 : vector<8x32xf32>
    %498 = math.exp %497 : vector<8x32xf32>
    %cst_139 = arith.constant 1.000000e+00 : f32
    %499 = vector.broadcast %cst_139 : f32 to vector<8x32xf32>
    %500 = arith.addf %499, %498 : vector<8x32xf32>
    %501 = arith.divf %499, %500 : vector<8x32xf32>
    %502 = arith.mulf %493, %474 : vector<8x32xf32>
    %503 = arith.mulf %487, %495 : vector<8x32xf32>
    %504 = arith.addf %502, %503 : vector<8x32xf32>
    %505 = math.tanh %504 : vector<8x32xf32>
    %506 = arith.mulf %501, %505 : vector<8x32xf32>
    %c7_i32_140 = arith.constant 7 : i32
    %507 = arith.index_cast %c7_i32_140 : i32 to index
    %c0_141 = arith.constant 0 : index
    %c0_142 = arith.constant 0 : index
    %508 = vector.load %arg13[%507, %c0_141, %c0_142] : memref<8x8x128xf32, #tpu.memory_space<vmem>>, vector<1x8x128xf32>
    %509 = vector.shape_cast %508 : vector<1x8x128xf32> to vector<8x128xf32>
    %cst_143 = arith.constant dense<0.000000e+00> : vector<8x128xf32>
    %510 = tpu.matmul %506, %294, %cst_143 {dimension_numbers = #tpu.dot_dimension_numbers<[1], [0], [0], [1], [0, 0, 1, 1], [], []>} : vector<8x32xf32>, vector<32x128xf32>, vector<8x128xf32> -> vector<8x128xf32>
    %511 = arith.addf %509, %510 : vector<8x128xf32>
    %512 = vector.extract_strided_slice %511 {offsets = [0, 0], sizes = [8, 32], strides = [1, 1]} : vector<8x128xf32> to vector<8x32xf32>
    %513 = arith.negf %512 : vector<8x32xf32>
    %514 = math.exp %513 : vector<8x32xf32>
    %cst_144 = arith.constant 1.000000e+00 : f32
    %515 = vector.broadcast %cst_144 : f32 to vector<8x32xf32>
    %516 = arith.addf %515, %514 : vector<8x32xf32>
    %517 = arith.divf %515, %516 : vector<8x32xf32>
    %518 = vector.extract_strided_slice %511 {offsets = [0, 32], sizes = [8, 32], strides = [1, 1]} : vector<8x128xf32> to vector<8x32xf32>
    %519 = arith.negf %518 : vector<8x32xf32>
    %520 = math.exp %519 : vector<8x32xf32>
    %cst_145 = arith.constant 1.000000e+00 : f32
    %521 = vector.broadcast %cst_145 : f32 to vector<8x32xf32>
    %522 = arith.addf %521, %520 : vector<8x32xf32>
    %523 = arith.divf %521, %522 : vector<8x32xf32>
    %524 = vector.extract_strided_slice %511 {offsets = [0, 64], sizes = [8, 32], strides = [1, 1]} : vector<8x128xf32> to vector<8x32xf32>
    %525 = math.tanh %524 : vector<8x32xf32>
    %526 = vector.extract_strided_slice %511 {offsets = [0, 96], sizes = [8, 32], strides = [1, 1]} : vector<8x128xf32> to vector<8x32xf32>
    %527 = arith.negf %526 : vector<8x32xf32>
    %528 = math.exp %527 : vector<8x32xf32>
    %cst_146 = arith.constant 1.000000e+00 : f32
    %529 = vector.broadcast %cst_146 : f32 to vector<8x32xf32>
    %530 = arith.addf %529, %528 : vector<8x32xf32>
    %531 = arith.divf %529, %530 : vector<8x32xf32>
    %532 = arith.mulf %523, %504 : vector<8x32xf32>
    %533 = arith.mulf %517, %525 : vector<8x32xf32>
    %534 = arith.addf %532, %533 : vector<8x32xf32>
    %535 = math.tanh %534 : vector<8x32xf32>
    %536 = arith.mulf %531, %535 : vector<8x32xf32>
    %c8_i32_147 = arith.constant 8 : i32
    %c0_148 = arith.constant 0 : index
    %c0_149 = arith.constant 0 : index
    %537 = vector.load %arg1[%c0_148, %c0_149] : memref<8x1xf32, #tpu.memory_space<vmem>>, vector<8x1xf32>
    %538 = vector.broadcast %537 : vector<8x1xf32> to vector<8x32xf32>
    %539 = arith.mulf %536, %538 : vector<8x32xf32>
    %c0_150 = arith.constant 0 : index
    %c0_151 = arith.constant 0 : index
    %540 = vector.load %arg8[%c0_150, %c0_151] : memref<32x1xf32, #tpu.memory_space<vmem>>, vector<32x1xf32>
    %cst_152 = arith.constant dense<0.000000e+00> : vector<8x1xf32>
    %541 = tpu.matmul %539, %540, %cst_152 {dimension_numbers = #tpu.dot_dimension_numbers<[1], [0], [0], [1], [0, 0, 1, 1], [], []>} : vector<8x32xf32>, vector<32x1xf32>, vector<8x1xf32> -> vector<8x1xf32>
    %c0_153 = arith.constant 0 : index
    %c0_154 = arith.constant 0 : index
    %542 = vector.load %arg9[%c0_153, %c0_154] : memref<1x1xf32, #tpu.memory_space<vmem>>, vector<1x1xf32>
    %543 = vector.broadcast %542 : vector<1x1xf32> to vector<8x1xf32>
    %544 = arith.addf %541, %543 : vector<8x1xf32>
    %c0_155 = arith.constant 0 : index
    %c0_156 = arith.constant 0 : index
    %545 = vector.load %arg10[%c0_155, %c0_156] : memref<8x1xf32, #tpu.memory_space<vmem>>, vector<8x1xf32>
    tpu.vector_store %arg10[%c0_155, %c0_156], %544 {strides = array<i32>} : memref<8x1xf32, #tpu.memory_space<vmem>>, vector<8x1xf32>,
    return
  }
}

</mosaic_0001>

<bundles_post_ra>
// kernel: tpu_custom_call.1
= control target key start
LH: loop header
LB: loop body
LE: loop exit
PB: predicated region body
PF: predicated region fallthrough
CT: control target
= control target key end

     0   :  { %vm47_vm0 = vcmask 130048   ;;  %v2750_v0 = vmov 0.0|0.0   ;;  %vm2751_vm1 = vmmov 0   ;;  %v2752_v4 = vmov 0.0   ;;  %s2753_s29 = smov 64   ;;  %s3174_s2 = inlined_call_operand.vmem [shape: f32[16,128], index: 2, kind: input, shape index: {}]   ;;  %s3175_s3 = inlined_call_operand.vmem [shape: f32[32,128], index: 3, kind: input, shape index: {}]   ;;  %s3176_s0 = inlined_call_operand.vmem [shape: f32[64,16], index: 0, kind: input, shape index: {}]   ;;  %s3177_s4 = inlined_call_operand.vmem [shape: f32[1,128], index: 4, kind: input, shape index: {}]   ;;  %s3178_s5 = inlined_call_operand.vmem [shape: f32[32,128], index: 5, kind: input, shape index: {}]   ;;  %s3179_s6 = inlined_call_operand.vmem [shape: f32[32,128], index: 6, kind: input, shape index: {}]   ;;  %s3180_s7 = inlined_call_operand.vmem [shape: f32[1,128], index: 7, kind: input, shape index: {}]   ;;  %s3181_s1 = inlined_call_operand.vmem [shape: f32[8,1], index: 1, kind: input, shape index: {}]   ;;  %s3182_s8 = inlined_call_operand.vmem [shape: f32[32,1], index: 8, kind: input, shape index: {}]   ;;  %s3183_s9 = inlined_call_operand.<no memory space> [shape: f32[1,1], index: 9, kind: input, shape index: {}]   ;;  %s3184_s10 = inlined_call_operand.vmem [shape: f32[8,1], index: 10, kind: output, shape index: {}]  }
   0x1   :  { %2505 = vmatprep.subr.bf16.mxu1 %v2750_v0  ;;  %v45_v1 = vld [vmem:[%s3174_s2] sm:$0xff]  ;;  %v46_v2 = vld [vmem:[%s3174_s2 + $0x8] sm:$0xff]  ;;  %2302 = vmatprep.mubr.msk.f32.mxu1 %vm2751_vm1, %v2752_v4  ;;  %v202_v9 = vld [vmem:[%s3175_s3 + $0x10] sm:$0xff]  ;;  %vm205_vm2 = vcmask 261120   ;;  %vm2115_vm3 = vcmask 7168  }
   0x2   :  { %v200_v3 = vld [vmem:[%s3175_s3] sm:$0xff]  ;;  %v2501_v5 = vpack.c.bf16 %v46_v2, %v45_v1  ;;  %v201_v6 = vld [vmem:[%s3175_s3 + $0x8] sm:$0xff]  ;;  %v203_v10 = vld [vmem:[%s3175_s3 + $0x18] sm:$0xff] }
   0x3   :  { %v37_v7 = vld [vmem:[%s3176_s0] sm:$0xff]  ;;  %v2829_v8 = vpack.c.bf16 %v201_v6, %v200_v3  ;;  %v38_v11 = vld [vmem:[%s3176_s0 + $0x8] sm:$0xff]  ;;  %v2842_v12 = vpack.c.bf16 %v203_v10, %v202_v9  ;;  %v39_v48 = vld [vmem:[%s3176_s0 + $0x10] sm:$0xff] }
   0x4   :  { %2282 = vmatprep.mubr.msk.f32.mxu0 %vm47_vm0, %v37_v7  ;;  %2502 = vmatprep.subr.bf16.mxu0 %v2501_v5  ;;  %v2863_v13 = vld [vmem:[%s3177_s4] ss:$0 sm:$0xff]  ;;  %s2754_s4 = smov 32   ;;  %v40_v49 = vld [vmem:[%s3176_s0 + $0x18] sm:$0xff]  ;;  %v42_v51 = vld [vmem:[%s3176_s0 + $0x28] sm:$0xff] }
   0x5   :  { %2507 = vmatpush3.bf16.msra.mxu1 %v2829_v8  ;;  %2504 = vmatpush3.bf16.msra.mxu0 %v2501_v5  ;;  %v41_v50 = vld [vmem:[%s3176_s0 + $0x20] sm:$0xff]  ;;  %v43_v52 = vld [vmem:[%s3176_s0 + $0x30] sm:$0xff]  ;;  %v44_v53 = vld [vmem:[%s3176_s0 + $0x38] sm:$0xff] }
   0x6   :  { %2508 = vmatprep.subr.bf16.mxu1 %v2750_v0  ;;  %2517 = vmatprep.subr.bf16.mxu0 %v2750_v0 }
   0x8   :  { %2283 = vmatmul.mubr.msk.f32.vlgmr.msra.gmra.mrb[0].mxu0 %vm47_vm0, %v38_v11 }
   0x9   :  { %2510 = vmatpush3.bf16.msra.mxu1 %v2842_v12  ;;  %2519 = vmatpush3.bf16.msra.mxu0 %v2829_v8 }
   0xa   :  { %2511 = vmatprep.subr.bf16.mxu1 %v2750_v0  ;;  %2520 = vmatprep.subr.bf16.mxu0 %v2750_v0 }
   0xb   :  { %2285 = vmatprep.mubr.msk.f32.mxu0 %vm47_vm0, %v39_v48 }
   0xc   :  { %2303 = vmatmul.mubr.f32.vlgmr.msra.gmra.mrb[0].mxu1 %v2752_v4  ;;  %2286 = vmatmul.mubr.msk.f32.gmra.mrb[2].mxu0 %vm47_vm0, %v40_v49 }
   0xd   :  { %2513 = vmatpush3.bf16.msra.mxu1 %v2829_v8  ;;  %2313 = vmatprep.mubr.msk.f32.mxu1 %vm2751_vm1, %v2752_v4 }
   0xe   :  { %2514 = vmatprep.subr.bf16.mxu1 %v2750_v0  ;;  %2522 = vmatpush3.bf16.msra.mxu0 %v2842_v12 }
   0xf   :  { %2529 = vmatprep.subr.bf16.mxu0 %v2750_v0  ;;  %2288 = vmatprep.mubr.msk.f32.mxu0 %vm47_vm0, %v41_v50 }
  0x10   :  { %2289 = vmatmul.mubr.msk.f32.gmra.mrb[4].mxu0 %vm47_vm0, %v42_v51 }
  0x11   :  { %2516 = vmatpush3.bf16.msra.mxu1 %v2842_v12  ;;  %2291 = vmatprep.mubr.msk.f32.mxu0 %vm47_vm0, %v43_v52 }
  0x12   :  { %2523 = vmatprep.subr.bf16.mxu1 %v2750_v0 }
  0x14   :  { %2292 = vmatmul.mubr.msk.f32.gmra.mrb[6].mxu0 %vm47_vm0, %v44_v53 }
  0x15   :  { %2324 = vmatprep.mubr.msk.f32.mxu0 %vm2751_vm1, %v2752_v4 }
  0xdb   :  { %v2284_v14 = vpop.f32.mrb[0].mxu0 }
  0xdc   :  { %v138_v15 = vpop.f32.mrb[1].mxu0  ;;  %v185_v34 = vadd.f32 %v2284_v14, %v2863_v13 }
  0xdd   :  { %v184_v16 = vadd.f32 %v2863_v13, %v138_v15 }
  0xdf   :  { %v275_v17 = vpop.f32.mrb[0].mxu1  ;;  %v2287_v57 = vpop.f32.mrb[2].mxu0 }
  0xe0   :  { %v279_v18 = vadd.f32 %v275_v17, %v184_v16  ;;  %v2304_v19 = vpop.f32.mrb[1].mxu1  ;;  %v148_v58 = vpop.f32.mrb[3].mxu0 }
  0xe1   :  { %v186_v1 = vadd.f32 %v2863_v13, %v148_v58 }
  0xe2   :  { %2622 = vtanh.f32 %v279_v18  ;;  %v2130_v21 = vmul.f32 -1.442695, %v279_v18 }
  0xe3   :  { %v2909_v59 = vpop.f32.mrb[4].mxu0 }
  0xe4   :  { %2624 = vpow2.f32 %v2130_v21  ;;  %v2911_v60 = vpop.f32.mrb[5].mxu0 }
  0xe7   :  { %v2913_v61 = vpop.f32.mrb[6].mxu0 }
  0xe8   :  { %v2915_v62 = vpop.f32.mrb[7].mxu0 }
  0xec   :  { %v2623_v20 = vpop.eup %2622 }
  0xed   :  { %289 = vrot.lane.b32.xlu0 %v2623_v20, %s2753_s29 }
  0xee   :  { %v2625_v22 = vpop.eup %2624 }
  0xef   :  { %v283_v23 = vadd.f32 1.0, %v2625_v22 }
  0xf1   :  { %2626 = vrcp.f32 %v283_v23  ;;  %v187_v23 = vadd.f32 %v2287_v57, %v2863_v13 }
  0xfb   :  { %v2627_v24 = vpop.eup %2626 }
  0xfc   :  { %v287_v27 = vmul.f32 0.0, %v2627_v24 }
 0x15f   :  { %v290_v25 = vpop.permute.xlu0 %289 }
 0x160   :  { %v292_v26 = vmul.f32 %v2627_v24, %v290_v25 }
 0x162   :  { %294 = vrot.lane.b32.xlu0 %v292_v26, %s2754_s4 }
 0x1d4   :  { %v295_v28 = vpop.permute.xlu0 %294 }
 0x1d5   :  { %v297_v29 = vadd.f32 %v295_v28, %v287_v27 }
 0x1d7   :  { %2628 = vtanh.f32 %v297_v29 }
 0x1e1   :  { %v2629_v30 = vpop.eup %2628 }
 0x1e2   :  { %300 = vrot.lane.b32.xlu1 %v2629_v30, %s2753_s29 }
 0x254   :  { %v301_v31 = vpop.permute.xlu1 %300 }
 0x255   :  { %v303_v32 = vmul.f32 %v2627_v24, %v301_v31 }
 0x257   :  { %305 = vrot.lane.b32.xlu1 %v303_v32, %s2754_s4 }
 0x2c9   :  { %v306_v33 = vpop.permute.xlu1 %305 }
 0x2ca   :  { %308 = vst.msk [vmem:[#allocation3] sm:$0xff] %vm205_vm2, %v306_v33  ;;  %2314 = vmatmul.mubr.msk.f32.vlgmr.msra.gmra.mrb[2].mxu1 %vm205_vm2, %v306_v33 }
 0x2cb   :  { %2525 = vmatpush3.bf16.msra.mxu1 %v2829_v8  ;;  %2335 = vmatprep.mubr.msk.f32.mxu1 %vm2751_vm1, %v2752_v4 }
 0x2cc   :  { %2526 = vmatprep.subr.bf16.mxu1 %v2750_v0 }
 0x2cf   :  { %2528 = vmatpush3.bf16.msra.mxu1 %v2842_v12 }
 0x2d0   :  { %2535 = vmatprep.subr.bf16.mxu1 %v2750_v0 }
 0x39d   :  { %v379_v35 = vpop.f32.mrb[2].mxu1 }
 0x39e   :  { %v383_v36 = vadd.f32 %v379_v35, %v185_v34  ;;  %v2315_v37 = vpop.f32.mrb[3].mxu1 }
 0x3a0   :  { %2630 = vtanh.f32 %v383_v36  ;;  %v2132_v39 = vmul.f32 -1.442695, %v383_v36 }
 0x3a2   :  { %2632 = vpow2.f32 %v2132_v39 }
 0x3aa   :  { %v2631_v38 = vpop.eup %2630 }
 0x3ab   :  { %393 = vrot.lane.b32.xlu0 %v2631_v38, %s2753_s29 }
 0x3ac   :  { %v2633_v40 = vpop.eup %2632 }
 0x3ad   :  { %v387_v41 = vadd.f32 1.0, %v2633_v40 }
 0x3af   :  { %2634 = vrcp.f32 %v387_v41  ;;  %v188_v41 = vadd.f32 %v2863_v13, %v2911_v60  ;;  %v189_v60 = vadd.f32 %v2909_v59, %v2863_v13 }
 0x3b9   :  { %v2635_v42 = vpop.eup %2634 }
 0x3ba   :  { %v391_v45 = vmul.f32 %v2635_v42, %v297_v29 }
 0x41d   :  { %v394_v43 = vpop.permute.xlu0 %393 }
 0x41e   :  { %v396_v44 = vmul.f32 %v2635_v42, %v394_v43 }
 0x420   :  { %398 = vrot.lane.b32.xlu1 %v396_v44, %s2754_s4 }
 0x492   :  { %v399_v46 = vpop.permute.xlu1 %398 }
 0x493   :  { %v401_v47 = vadd.f32 %v399_v46, %v391_v45 }
 0x495   :  { %2636 = vtanh.f32 %v401_v47 }
 0x49f   :  { %v2637_v54 = vpop.eup %2636 }
 0x4a0   :  { %404 = vrot.lane.b32.xlu0 %v2637_v54, %s2753_s29 }
 0x512   :  { %v405_v55 = vpop.permute.xlu0 %404 }
 0x513   :  { %v407_v56 = vmul.f32 %v2635_v42, %v405_v55 }
 0x515   :  { %409 = vrot.lane.b32.xlu1 %v407_v56, %s2754_s4 }
 0x587   :  { %v410_v63 = vpop.permute.xlu1 %409 }
 0x588   :  { %413 = vst.msk [vmem:[#allocation3 + $0x8] sm:$0xff] %vm205_vm2, %v410_v63  ;;  %2325 = vmatmul.mubr.msk.f32.vlgmr.msra.gmra.mrb[8].mxu0 %vm205_vm2, %v410_v63 }
 0x589   :  { %2531 = vmatpush3.bf16.msra.mxu0 %v2829_v8  ;;  %2346 = vmatprep.mubr.msk.f32.mxu0 %vm2751_vm1, %v2752_v4 }
 0x58a   :  { %2532 = vmatprep.subr.bf16.mxu0 %v2750_v0 }
 0x58d   :  { %2534 = vmatpush3.bf16.msra.mxu0 %v2842_v12 }
 0x58e   :  { %2541 = vmatprep.subr.bf16.mxu0 %v2750_v0 }
 0x65b   :  { %v484_v2 = vpop.f32.mrb[8].mxu0 }
 0x65c   :  { %v488_v3 = vadd.f32 %v484_v2, %v186_v1  ;;  %v2326_v5 = vpop.f32.mrb[9].mxu0 }
 0x65e   :  { %2638 = vtanh.f32 %v488_v3  ;;  %v2134_v7 = vmul.f32 -1.442695, %v488_v3 }
 0x660   :  { %2640 = vpow2.f32 %v2134_v7 }
 0x668   :  { %v2639_v6 = vpop.eup %2638 }
 0x669   :  { %498 = vrot.lane.b32.xlu0 %v2639_v6, %s2753_s29 }
 0x66a   :  { %v2641_v9 = vpop.eup %2640 }
 0x66b   :  { %v492_v10 = vadd.f32 1.0, %v2641_v9 }
 0x66d   :  { %2642 = vrcp.f32 %v492_v10 }
 0x677   :  { %v2643_v11 = vpop.eup %2642 }
 0x678   :  { %v496_v16 = vmul.f32 %v2643_v11, %v401_v47 }
 0x6db   :  { %v499_v14 = vpop.permute.xlu0 %498 }
 0x6dc   :  { %v501_v15 = vmul.f32 %v2643_v11, %v499_v14  ;;  %v1052_v14 = vld [vmem:[%s3178_s5] sm:$0xff] }
 0x6de   :  { %503 = vrot.lane.b32.xlu1 %v501_v15, %s2754_s4  ;;  %v1053_v15 = vld [vmem:[%s3178_s5 + $0x8] sm:$0xff] }
 0x750   :  { %v504_v17 = vpop.permute.xlu1 %503 }
 0x751   :  { %v506_v18 = vadd.f32 %v504_v17, %v496_v16  ;;  %v2553_v16 = vpack.c.bf16 %v1053_v15, %v1052_v14 }
 0x753   :  { %2644 = vtanh.f32 %v506_v18 }
 0x75d   :  { %v2645_v19 = vpop.eup %2644 }
 0x75e   :  { %509 = vrot.lane.b32.xlu0 %v2645_v19, %s2753_s29 }
 0x7d0   :  { %v510_v20 = vpop.permute.xlu0 %509 }
 0x7d1   :  { %v512_v21 = vmul.f32 %v2643_v11, %v510_v20  ;;  %v1054_v20 = vld [vmem:[%s3178_s5 + $0x10] sm:$0xff] }
 0x7d3   :  { %514 = vrot.lane.b32.xlu1 %v512_v21, %s2754_s4  ;;  %v1055_v21 = vld [vmem:[%s3178_s5 + $0x18] sm:$0xff] }
 0x845   :  { %v515_v22 = vpop.permute.xlu1 %514 }
 0x846   :  { %518 = vst.msk [vmem:[#allocation3 + $0x10] sm:$0xff] %vm205_vm2, %v515_v22  ;;  %2336 = vmatmul.mubr.msk.f32.vlgmr.msra.gmra.mrb[4].mxu1 %vm205_vm2, %v515_v22  ;;  %v2557_v22 = vpack.c.bf16 %v1055_v21, %v1054_v20 }
 0x847   :  { %2537 = vmatpush3.bf16.msra.mxu1 %v2829_v8  ;;  %2357 = vmatprep.mubr.msk.f32.mxu1 %vm2751_vm1, %v2752_v4 }
 0x848   :  { %2538 = vmatprep.subr.bf16.mxu1 %v2750_v0 }
 0x84b   :  { %2540 = vmatpush3.bf16.msra.mxu1 %v2842_v12 }
 0x84c   :  { %2547 = vmatprep.subr.bf16.mxu1 %v2750_v0 }
 0x919   :  { %v589_v24 = vpop.f32.mrb[4].mxu1 }
 0x91a   :  { %v593_v25 = vadd.f32 %v589_v24, %v187_v23  ;;  %v2337_v26 = vpop.f32.mrb[5].mxu1  ;;  %v1044_v24 = vld [vmem:[#allocation3] sm:$0xff] }
 0x91b   :  { %v1046_v26 = vld [vmem:[#allocation3 + $0x10] sm:$0xff] }
 0x91c   :  { %2646 = vtanh.f32 %v593_v25  ;;  %v2136_v28 = vmul.f32 -1.442695, %v593_v25  ;;  %v1045_v25 = vld [vmem:[#allocation3 + $0x8] sm:$0xff] }
 0x91e   :  { %2648 = vpow2.f32 %v2136_v28 }
 0x926   :  { %v2647_v27 = vpop.eup %2646 }
 0x927   :  { %603 = vrot.lane.b32.xlu0 %v2647_v27, %s2753_s29 }
 0x928   :  { %v2649_v29 = vpop.eup %2648 }
 0x929   :  { %v597_v30 = vadd.f32 1.0, %v2649_v29 }
 0x92b   :  { %2650 = vrcp.f32 %v597_v30  ;;  %v190_v30 = vadd.f32 %v2863_v13, %v2915_v62 }
 0x935   :  { %v2651_v31 = vpop.eup %2650 }
 0x936   :  { %v601_v34 = vmul.f32 %v2651_v31, %v506_v18 }
 0x999   :  { %v604_v32 = vpop.permute.xlu0 %603 }
 0x99a   :  { %v606_v33 = vmul.f32 %v2651_v31, %v604_v32 }
 0x99c   :  { %608 = vrot.lane.b32.xlu1 %v606_v33, %s2754_s4 }
 0xa0e   :  { %v609_v35 = vpop.permute.xlu1 %608 }
 0xa0f   :  { %v611_v36 = vadd.f32 %v609_v35, %v601_v34 }
 0xa11   :  { %2652 = vtanh.f32 %v611_v36 }
 0xa1b   :  { %v2653_v37 = vpop.eup %2652 }
 0xa1c   :  { %614 = vrot.lane.b32.xlu0 %v2653_v37, %s2753_s29 }
 0xa8e   :  { %v615_v38 = vpop.permute.xlu0 %614 }
 0xa8f   :  { %v617_v39 = vmul.f32 %v2651_v31, %v615_v38 }
 0xa91   :  { %619 = vrot.lane.b32.xlu1 %v617_v39, %s2754_s4 }
 0xb03   :  { %v620_v40 = vpop.permute.xlu1 %619 }
 0xb04   :  { %623 = vst.msk [vmem:[#allocation3 + $0x18] sm:$0xff] %vm205_vm2, %v620_v40  ;;  %2347 = vmatmul.mubr.msk.f32.vlgmr.msra.gmra.mrb[10].mxu0 %vm205_vm2, %v620_v40 }
 0xb05   :  { %2543 = vmatpush3.bf16.msra.mxu0 %v2829_v8  ;;  %2368 = vmatprep.mubr.msk.f32.mxu0 %vm2751_vm1, %v2752_v4 }
 0xb06   :  { %2544 = vmatprep.subr.bf16.mxu0 %v2750_v0 }
 0xb09   :  { %2546 = vmatpush3.bf16.msra.mxu0 %v2842_v12 }
 0xb0a   :  { %2554 = vmatprep.subr.bf16.mxu0 %v2553_v16 }
 0xb0b   :  { %v1047_v27 = vld [vmem:[#allocation3 + $0x18] sm:$0xff] }
 0xbd7   :  { %v694_v42 = vpop.f32.mrb[10].mxu0 }
 0xbd8   :  { %v698_v43 = vadd.f32 %v694_v42, %v188_v41  ;;  %v2348_v44 = vpop.f32.mrb[11].mxu0 }
 0xbda   :  { %2654 = vtanh.f32 %v698_v43  ;;  %v2138_v46 = vmul.f32 -1.442695, %v698_v43 }
 0xbdc   :  { %2656 = vpow2.f32 %v2138_v46 }
 0xbe4   :  { %v2655_v45 = vpop.eup %2654 }
 0xbe5   :  { %708 = vrot.lane.b32.xlu0 %v2655_v45, %s2753_s29 }
 0xbe6   :  { %v2657_v47 = vpop.eup %2656 }
 0xbe7   :  { %v702_v48 = vadd.f32 1.0, %v2657_v47 }
 0xbe9   :  { %2658 = vrcp.f32 %v702_v48 }
 0xbf3   :  { %v2659_v49 = vpop.eup %2658 }
 0xbf4   :  { %v706_v52 = vmul.f32 %v2659_v49, %v611_v36 }
 0xc57   :  { %v709_v50 = vpop.permute.xlu0 %708 }
 0xc58   :  { %v711_v51 = vmul.f32 %v2659_v49, %v709_v50  ;;  %v1208_v50 = vld [vmem:[%s3179_s6] sm:$0xff] }
 0xc5a   :  { %713 = vrot.lane.b32.xlu1 %v711_v51, %s2754_s4  ;;  %v1209_v51 = vld [vmem:[%s3179_s6 + $0x8] sm:$0xff] }
 0xccc   :  { %v714_v53 = vpop.permute.xlu1 %713 }
 0xccd   :  { %v716_v54 = vadd.f32 %v714_v53, %v706_v52  ;;  %v3015_v52 = vpack.c.bf16 %v1209_v51, %v1208_v50  ;;  %v1210_v53 = vld [vmem:[%s3179_s6 + $0x10] sm:$0xff] }
 0xccf   :  { %2660 = vtanh.f32 %v716_v54 }
 0xcd9   :  { %v2661_v55 = vpop.eup %2660 }
 0xcda   :  { %719 = vrot.lane.b32.xlu0 %v2661_v55, %s2753_s29 }
 0xd4c   :  { %v720_v56 = vpop.permute.xlu0 %719 }
 0xd4d   :  { %v722_v57 = vmul.f32 %v2659_v49, %v720_v56 }
 0xd4f   :  { %724 = vrot.lane.b32.xlu1 %v722_v57, %s2754_s4 }
 0xdc1   :  { %v725_v58 = vpop.permute.xlu1 %724 }
 0xdc2   :  { %728 = vst.msk [vmem:[#allocation3 + $0x20] sm:$0xff] %vm205_vm2, %v725_v58  ;;  %2358 = vmatmul.mubr.msk.f32.vlgmr.msra.gmra.mrb[6].mxu1 %vm205_vm2, %v725_v58 }
 0xdc3   :  { %2549 = vmatpush3.bf16.msra.mxu1 %v2829_v8  ;;  %2379 = vmatprep.mubr.msk.f32.mxu1 %vm2751_vm1, %v2752_v4 }
 0xdc4   :  { %2550 = vmatprep.subr.bf16.mxu1 %v2750_v0 }
 0xdc7   :  { %2552 = vmatpush3.bf16.msra.mxu1 %v2842_v12 }
 0xdc8   :  { %2561 = vmatprep.subr.bf16.mxu1 %v2750_v0 }
 0xdc9   :  { %v1048_v28 = vld [vmem:[#allocation3 + $0x20] sm:$0xff] }
 0xe95   :  { %v799_v63 = vpop.f32.mrb[6].mxu1 }
 0xe96   :  { %v803_v1 = vadd.f32 %v799_v63, %v189_v60  ;;  %v2359_v2 = vpop.f32.mrb[7].mxu1  ;;  %v191_v63 = vadd.f32 %v2913_v61, %v2863_v13 }
 0xe98   :  { %2662 = vtanh.f32 %v803_v1  ;;  %v2140_v8 = vmul.f32 -1.442695, %v803_v1 }
 0xe9a   :  { %2664 = vpow2.f32 %v2140_v8  ;;  %v3051_v8 = vld [vmem:[%s3180_s7] ss:$0 sm:$0xff] }
 0xea2   :  { %v2663_v3 = vpop.eup %2662 }
 0xea3   :  { %813 = vrot.lane.b32.xlu0 %v2663_v3, %s2753_s29 }
 0xea4   :  { %v2665_v5 = vpop.eup %2664 }
 0xea5   :  { %v807_v6 = vadd.f32 1.0, %v2665_v5 }
 0xea7   :  { %2666 = vrcp.f32 %v807_v6 }
 0xeb1   :  { %v2667_v7 = vpop.eup %2666 }
 0xeb2   :  { %v811_v10 = vmul.f32 %v2667_v7, %v716_v54  ;;  %v1211_v54 = vld [vmem:[%s3179_s6 + $0x18] sm:$0xff] }
 0xeb3   :  { %v3025_v55 = vpack.c.bf16 %v1211_v54, %v1210_v53 }
 0xf15   :  { %v814_v9 = vpop.permute.xlu0 %813 }
 0xf16   :  { %v816_v12 = vmul.f32 %v2667_v7, %v814_v9 }
 0xf18   :  { %818 = vrot.lane.b32.xlu1 %v816_v12, %s2754_s4 }
 0xf8a   :  { %v819_v11 = vpop.permute.xlu1 %818 }
 0xf8b   :  { %v821_v59 = vadd.f32 %v819_v11, %v811_v10 }
 0xf8d   :  { %2668 = vtanh.f32 %v821_v59 }
 0xf97   :  { %v2669_v17 = vpop.eup %2668 }
 0xf98   :  { %824 = vrot.lane.b32.xlu0 %v2669_v17, %s2753_s29 }
0x100a   :  { %v825_v18 = vpop.permute.xlu0 %824 }
0x100b   :  { %v827_v19 = vmul.f32 %v2667_v7, %v825_v18 }
0x100d   :  { %829 = vrot.lane.b32.xlu1 %v827_v19, %s2754_s4 }
0x107f   :  { %v830_v23 = vpop.permute.xlu1 %829 }
0x1080   :  { %833 = vst.msk [vmem:[#allocation3 + $0x28] sm:$0xff] %vm205_vm2, %v830_v23  ;;  %2369 = vmatmul.mubr.msk.f32.vlgmr.msra.gmra.mrb[12].mxu0 %vm205_vm2, %v830_v23 }
0x1081   :  { %2556 = vmatpush3.bf16.msra.mxu0 %v2553_v16  ;;  %2390 = vmatprep.mubr.msk.f32.mxu0 %vm205_vm2, %v1044_v24 }
0x1082   :  { %2558 = vmatprep.subr.bf16.mxu0 %v2557_v22 }
0x1085   :  { %2560 = vmatpush3.bf16.msra.mxu0 %v2557_v22 }
0x1086   :  { %2573 = vmatprep.subr.bf16.mxu0 %v2750_v0 }
0x1087   :  { %v1049_v29 = vld [vmem:[#allocation3 + $0x28] sm:$0xff] }
0x1088   :  { %2391 = vmatmul.mubr.msk.f32.vlgmr.msra.gmra.mrb[14].mxu0 %vm205_vm2, %v1045_v25 }
0x1089   :  { %2393 = vmatprep.mubr.msk.f32.mxu0 %vm205_vm2, %v1046_v26  ;;  %2575 = vmatpush3.bf16.msra.mxu0 %v3015_v52 }
0x108a   :  { %2576 = vmatprep.subr.bf16.mxu0 %v2750_v0 }
0x108c   :  { %2394 = vmatmul.mubr.msk.f32.gmra.mrb[16].mxu0 %vm205_vm2, %v1047_v27 }
0x108d   :  { %2396 = vmatprep.mubr.msk.f32.mxu0 %vm205_vm2, %v1048_v28  ;;  %2578 = vmatpush3.bf16.msra.mxu0 %v3025_v55 }
0x108e   :  { %2585 = vmatprep.subr.bf16.mxu0 %v2750_v0 }
0x1090   :  { %2397 = vmatmul.mubr.msk.f32.gmra.mrb[18].mxu0 %vm205_vm2, %v1049_v29 }
0x1153   :  { %v904_v31 = vpop.f32.mrb[12].mxu0 }
0x1154   :  { %v908_v32 = vadd.f32 %v904_v31, %v190_v30  ;;  %v2370_v33 = vpop.f32.mrb[13].mxu0 }
0x1156   :  { %2670 = vtanh.f32 %v908_v32  ;;  %v2142_v41 = vmul.f32 -1.442695, %v908_v32 }
0x1158   :  { %2672 = vpow2.f32 %v2142_v41 }
0x115b   :  { %v2993_v34 = vpop.f32.mrb[14].mxu0 }
0x115c   :  { %v1146_v35 = vpop.f32.mrb[15].mxu0 }
0x115d   :  { %v1192_v5 = vadd.f32 %v3051_v8, %v1146_v35 }
0x115f   :  { %v2995_v36 = vpop.f32.mrb[16].mxu0 }
0x1160   :  { %v2671_v37 = vpop.eup %2670  ;;  %v2997_v38 = vpop.f32.mrb[17].mxu0 }
0x1161   :  { %918 = vrot.lane.b32.xlu0 %v2671_v37, %s2753_s29  ;;  %v1193_v37 = vadd.f32 %v2993_v34, %v3051_v8 }
0x1162   :  { %v2673_v62 = vpop.eup %2672 }
0x1163   :  { %v3000_v39 = vpop.f32.mrb[18].mxu0  ;;  %v912_v42 = vadd.f32 1.0, %v2673_v62 }
0x1164   :  { %v3002_v40 = vpop.f32.mrb[19].mxu0 }
0x1165   :  { %2674 = vrcp.f32 %v912_v42 }
0x116f   :  { %v2675_v43 = vpop.eup %2674 }
0x1170   :  { %v916_v46 = vmul.f32 %v2675_v43, %v821_v59 }
0x11d3   :  { %v919_v44 = vpop.permute.xlu0 %918 }
0x11d4   :  { %v921_v45 = vmul.f32 %v2675_v43, %v919_v44 }
0x11d6   :  { %923 = vrot.lane.b32.xlu1 %v921_v45, %s2754_s4 }
0x1248   :  { %v924_v47 = vpop.permute.xlu1 %923 }
0x1249   :  { %v3005_v48 = vadd.f32 %v924_v47, %v916_v46 }
0x124b   :  { %2676 = vtanh.f32 %v3005_v48 }
0x1255   :  { %v2677_v49 = vpop.eup %2676 }
0x1256   :  { %929 = vrot.lane.b32.xlu0 %v2677_v49, %s2753_s29 }
0x12c8   :  { %v930_v56 = vpop.permute.xlu0 %929 }
0x12c9   :  { %v932_v57 = vmul.f32 %v2675_v43, %v930_v56 }
0x12cb   :  { %934 = vrot.lane.b32.xlu1 %v932_v57, %s2754_s4 }
0x133d   :  { %v935_v58 = vpop.permute.xlu1 %934 }
0x133e   :  { %938 = vst.msk [vmem:[#allocation3 + $0x30] sm:$0xff] %vm205_vm2, %v935_v58  ;;  %2380 = vmatmul.mubr.msk.f32.vlgmr.msra.gmra.mrb[8].mxu1 %vm205_vm2, %v935_v58 }
0x133f   :  { %2563 = vmatpush3.bf16.msra.mxu1 %v3015_v52  ;;  %2410 = vmatprep.mubr.msk.f32.mxu1 %vm2751_vm1, %v2752_v4 }
0x1340   :  { %2564 = vmatprep.subr.bf16.mxu1 %v2750_v0 }
0x1343   :  { %2566 = vmatpush3.bf16.msra.mxu1 %v3025_v55 }
0x1344   :  { %2567 = vmatprep.subr.bf16.mxu1 %v2750_v0 }
0x1345   :  { %v1050_v60 = vld [vmem:[#allocation3 + $0x30] sm:$0xff] }
0x1346   :  { %2411 = vmatmul.mubr.f32.vlgmr.msra.gmra.mrb[10].mxu1 %v2752_v4  ;;  %2399 = vmatprep.mubr.msk.f32.mxu0 %vm205_vm2, %v1050_v60 }
0x1347   :  { %2569 = vmatpush3.bf16.msra.mxu1 %v3015_v52  ;;  %2421 = vmatprep.mubr.msk.f32.mxu1 %vm2751_vm1, %v2752_v4 }
0x1348   :  { %2570 = vmatprep.subr.bf16.mxu1 %v2750_v0 }
0x134b   :  { %2572 = vmatpush3.bf16.msra.mxu1 %v3025_v55 }
0x134c   :  { %2579 = vmatprep.subr.bf16.mxu1 %v2750_v0 }
0x1411   :  { %v1009_v1 = vpop.f32.mrb[8].mxu1 }
0x1412   :  { %v1013_v2 = vadd.f32 %v1009_v1, %v191_v63  ;;  %v2381_v3 = vpop.f32.mrb[9].mxu1 }
0x1414   :  { %v2144_v20 = vmul.f32 -1.442695, %v1013_v2 }
0x1419   :  { %v1279_v6 = vpop.f32.mrb[10].mxu1 }
0x141a   :  { %v1283_v7 = vadd.f32 %v1279_v6, %v1192_v5  ;;  %v2412_v9 = vpop.f32.mrb[11].mxu1 }
0x141c   :  { %2678 = vtanh.f32 %v1283_v7  ;;  %v2154_v10 = vmul.f32 -1.442695, %v1283_v7 }
0x141e   :  { %2680 = vpow2.f32 %v2154_v10 }
0x1426   :  { %v2679_v12 = vpop.eup %2678 }
0x1427   :  { %1293 = vrot.lane.b32.xlu0 %v2679_v12, %s2753_s29 }
0x1428   :  { %v2681_v13 = vpop.eup %2680 }
0x1429   :  { %v1287_v61 = vadd.f32 1.0, %v2681_v13 }
0x142b   :  { %2682 = vrcp.f32 %v1287_v61 }
0x1435   :  { %v2683_v11 = vpop.eup %2682 }
0x1436   :  { %v1291_v15 = vmul.f32 0.0, %v2683_v11 }
0x1499   :  { %v1294_v59 = vpop.permute.xlu0 %1293 }
0x149a   :  { %v1296_v14 = vmul.f32 %v2683_v11, %v1294_v59 }
0x149c   :  { %1298 = vrot.lane.b32.xlu1 %v1296_v14, %s2754_s4 }
0x150e   :  { %v1299_v16 = vpop.permute.xlu1 %1298 }
0x150f   :  { %v1301_v17 = vadd.f32 %v1299_v16, %v1291_v15 }
0x1511   :  { %2684 = vtanh.f32 %v1301_v17 }
0x1512   :  { %2686 = vtanh.f32 %v1013_v2  ;;  %v1194_v2 = vadd.f32 %v3051_v8, %v2997_v38 }
0x1513   :  { %2688 = vpow2.f32 %v2144_v20 }
0x151b   :  { %v2685_v18 = vpop.eup %2684 }
0x151c   :  { %1304 = vrot.lane.b32.xlu0 %v2685_v18, %s2753_s29  ;;  %v2687_v19 = vpop.eup %2686 }
0x151d   :  { %v2689_v21 = vpop.eup %2688 }
0x151e   :  { %v1017_v22 = vadd.f32 1.0, %v2689_v21 }
0x1520   :  { %1023 = vrot.lane.b32.xlu0 %v2687_v19, %s2753_s29  ;;  %2690 = vrcp.f32 %v1017_v22  ;;  %v1195_v19 = vadd.f32 %v2995_v36, %v3051_v8 }
0x152a   :  { %v2691_v25 = vpop.eup %2690 }
0x152b   :  { %v1021_v29 = vmul.f32 %v2691_v25, %v3005_v48 }
0x158e   :  { %v1305_v23 = vpop.permute.xlu0 %1304 }
0x158f   :  { %v1307_v24 = vmul.f32 %v2683_v11, %v1305_v23 }
0x1591   :  { %1311 = vrot.lane.b32.xlu1 %v1307_v24, %s2754_s4 }
0x1592   :  { %v1024_v26 = vpop.permute.xlu0 %1023 }
0x1593   :  { %v1026_v27 = vmul.f32 %v2691_v25, %v1024_v26 }
0x1595   :  { %1028 = vrot.lane.b32.xlu0 %v1026_v27, %s2754_s4 }
0x1603   :  { %v1312_v28 = vpop.permute.xlu1 %1311 }
0x1604   :  { %2422 = vmatmul.mubr.msk.f32.vlgmr.msra.gmra.mrb[12].mxu1 %vm205_vm2, %v1312_v28 }
0x1605   :  { %2581 = vmatpush3.bf16.msra.mxu1 %v3015_v52  ;;  %2443 = vmatprep.mubr.msk.f32.mxu1 %vm2751_vm1, %v2752_v4 }
0x1606   :  { %2582 = vmatprep.subr.bf16.mxu1 %v2750_v0 }
0x1607   :  { %v1029_v30 = vpop.permute.xlu0 %1028 }
0x1608   :  { %v1031_v31 = vadd.f32 %v1029_v30, %v1021_v29 }
0x1609   :  { %2584 = vmatpush3.bf16.msra.mxu1 %v3025_v55 }
0x160a   :  { %2692 = vtanh.f32 %v1031_v31  ;;  %2591 = vmatprep.subr.bf16.mxu1 %v2750_v0 }
0x1614   :  { %v2693_v32 = vpop.eup %2692 }
0x1615   :  { %1034 = vrot.lane.b32.xlu0 %v2693_v32, %s2753_s29 }
0x1687   :  { %v1035_v33 = vpop.permute.xlu0 %1034 }
0x1688   :  { %v1037_v35 = vmul.f32 %v2691_v25, %v1035_v33 }
0x168a   :  { %1039 = vrot.lane.b32.xlu0 %v1037_v35, %s2754_s4 }
0x16d7   :  { %v1381_v41 = vpop.f32.mrb[12].mxu1 }
0x16d8   :  { %v1385_v62 = vadd.f32 %v1381_v41, %v1193_v37  ;;  %v2423_v42 = vpop.f32.mrb[13].mxu1  ;;  %v1196_v41 = vadd.f32 %v3051_v8, %v3002_v40 }
0x16da   :  { %2694 = vtanh.f32 %v1385_v62  ;;  %v2156_v46 = vmul.f32 -1.442695, %v1385_v62 }
0x16dc   :  { %2696 = vpow2.f32 %v2156_v46 }
0x16e4   :  { %v2695_v43 = vpop.eup %2694 }
0x16e5   :  { %1395 = vrot.lane.b32.xlu1 %v2695_v43, %s2753_s29 }
0x16e6   :  { %v2697_v47 = vpop.eup %2696 }
0x16e7   :  { %v1389_v34 = vadd.f32 1.0, %v2697_v47 }
0x16e9   :  { %2698 = vrcp.f32 %v1389_v34 }
0x16f3   :  { %v2699_v48 = vpop.eup %2698 }
0x16f4   :  { %v1393_v51 = vmul.f32 %v2699_v48, %v1301_v17 }
0x16fc   :  { %v1040_v44 = vpop.permute.xlu0 %1039 }
0x16fd   :  { %1043 = vst.msk [vmem:[#allocation3 + $0x38] sm:$0xff] %vm205_vm2, %v1040_v44 }
0x1704   :  { %v1051_v45 = vld [vmem:[#allocation3 + $0x38] sm:$0xff] }
0x1705   :  { %2400 = vmatmul.mubr.msk.f32.gmra.mrb[20].mxu0 %vm205_vm2, %v1051_v45 }
0x1706   :  { %2432 = vmatprep.mubr.msk.f32.mxu0 %vm2751_vm1, %v2752_v4 }
0x1757   :  { %v1396_v49 = vpop.permute.xlu1 %1395 }
0x1758   :  { %v1398_v50 = vmul.f32 %v2699_v48, %v1396_v49 }
0x175a   :  { %1400 = vrot.lane.b32.xlu1 %v1398_v50, %s2754_s4 }
0x17cc   :  { %v1401_v53 = vpop.permute.xlu1 %1400 }
0x17cd   :  { %v1403_v54 = vadd.f32 %v1401_v53, %v1393_v51 }
0x17cf   :  { %2700 = vtanh.f32 %v1403_v54 }
0x17d8   :  { %v3078_v56 = vpop.f32.mrb[20].mxu0 }
0x17d9   :  { %v2701_v57 = vpop.eup %2700  ;;  %v3080_v58 = vpop.f32.mrb[21].mxu0 }
0x17da   :  { %1406 = vrot.lane.b32.xlu1 %v2701_v57, %s2753_s29 }
0x184c   :  { %v1407_v60 = vpop.permute.xlu1 %1406 }
0x184d   :  { %v1409_v63 = vmul.f32 %v2699_v48, %v1407_v60 }
0x184f   :  { %1413 = vrot.lane.b32.xlu1 %v1409_v63, %s2754_s4  ;;  %v1197_v63 = vadd.f32 %v3000_v39, %v3051_v8 }
0x18c1   :  { %v1414_v1 = vpop.permute.xlu1 %1413 }
0x18c2   :  { %2433 = vmatmul.mubr.msk.f32.vlgmr.msra.gmra.mrb[22].mxu0 %vm205_vm2, %v1414_v1 }
0x18c3   :  { %2587 = vmatpush3.bf16.msra.mxu0 %v3015_v52  ;;  %2454 = vmatprep.mubr.msk.f32.mxu0 %vm2751_vm1, %v2752_v4 }
0x18c4   :  { %2588 = vmatprep.subr.bf16.mxu0 %v2750_v0 }
0x18c7   :  { %2590 = vmatpush3.bf16.msra.mxu0 %v3025_v55 }
0x18c8   :  { %2597 = vmatprep.subr.bf16.mxu0 %v2750_v0 }
0x1995   :  { %v1483_v3 = vpop.f32.mrb[22].mxu0 }
0x1996   :  { %v1487_v5 = vadd.f32 %v1483_v3, %v1194_v2  ;;  %v2434_v6 = vpop.f32.mrb[23].mxu0 }
0x1998   :  { %2702 = vtanh.f32 %v1487_v5  ;;  %v2158_v9 = vmul.f32 -1.442695, %v1487_v5 }
0x199a   :  { %2704 = vpow2.f32 %v2158_v9 }
0x19a2   :  { %v2703_v7 = vpop.eup %2702 }
0x19a3   :  { %1497 = vrot.lane.b32.xlu0 %v2703_v7, %s2753_s29 }
0x19a4   :  { %v2705_v12 = vpop.eup %2704 }
0x19a5   :  { %v1491_v10 = vadd.f32 1.0, %v2705_v12 }
0x19a7   :  { %2706 = vrcp.f32 %v1491_v10 }
0x19b1   :  { %v2707_v13 = vpop.eup %2706 }
0x19b2   :  { %v1495_v59 = vmul.f32 %v2707_v13, %v1403_v54 }
0x1a15   :  { %v1498_v61 = vpop.permute.xlu0 %1497 }
0x1a16   :  { %v1500_v11 = vmul.f32 %v2707_v13, %v1498_v61 }
0x1a18   :  { %1502 = vrot.lane.b32.xlu1 %v1500_v11, %s2754_s4 }
0x1a8a   :  { %v1503_v14 = vpop.permute.xlu1 %1502 }
0x1a8b   :  { %v1505_v38 = vadd.f32 %v1503_v14, %v1495_v59 }
0x1a8d   :  { %2708 = vtanh.f32 %v1505_v38 }
0x1a97   :  { %v2709_v15 = vpop.eup %2708 }
0x1a98   :  { %1508 = vrot.lane.b32.xlu0 %v2709_v15, %s2753_s29 }
0x1b0a   :  { %v1509_v16 = vpop.permute.xlu0 %1508 }
0x1b0b   :  { %v1511_v17 = vmul.f32 %v2707_v13, %v1509_v16 }
0x1b0d   :  { %1515 = vrot.lane.b32.xlu1 %v1511_v17, %s2754_s4 }
0x1b7f   :  { %v1516_v18 = vpop.permute.xlu1 %1515 }
0x1b80   :  { %2444 = vmatmul.mubr.msk.f32.vlgmr.msra.gmra.mrb[14].mxu1 %vm205_vm2, %v1516_v18 }
0x1b81   :  { %2593 = vmatpush3.bf16.msra.mxu1 %v3015_v52  ;;  %2465 = vmatprep.mubr.msk.f32.mxu1 %vm2751_vm1, %v2752_v4 }
0x1b82   :  { %2594 = vmatprep.subr.bf16.mxu1 %v2750_v0 }
0x1b85   :  { %2596 = vmatpush3.bf16.msra.mxu1 %v3025_v55 }
0x1b86   :  { %2603 = vmatprep.subr.bf16.mxu1 %v2750_v0 }
0x1c53   :  { %v1585_v20 = vpop.f32.mrb[14].mxu1 }
0x1c54   :  { %v1589_v21 = vadd.f32 %v1585_v20, %v1195_v19  ;;  %v2445_v22 = vpop.f32.mrb[15].mxu1 }
0x1c56   :  { %2710 = vtanh.f32 %v1589_v21  ;;  %v2160_v24 = vmul.f32 -1.442695, %v1589_v21 }
0x1c58   :  { %2712 = vpow2.f32 %v2160_v24 }
0x1c60   :  { %v2711_v23 = vpop.eup %2710 }
0x1c61   :  { %1599 = vrot.lane.b32.xlu0 %v2711_v23, %s2753_s29 }
0x1c62   :  { %v2713_v25 = vpop.eup %2712 }
0x1c63   :  { %v1593_v26 = vadd.f32 1.0, %v2713_v25 }
0x1c65   :  { %2714 = vrcp.f32 %v1593_v26 }
0x1c6f   :  { %v2715_v27 = vpop.eup %2714 }
0x1c70   :  { %v1597_v30 = vmul.f32 %v2715_v27, %v1505_v38  ;;  %v1198_v38 = vadd.f32 %v3051_v8, %v3080_v58 }
0x1cd3   :  { %v1600_v28 = vpop.permute.xlu0 %1599 }
0x1cd4   :  { %v1602_v29 = vmul.f32 %v2715_v27, %v1600_v28 }
0x1cd6   :  { %1604 = vrot.lane.b32.xlu1 %v1602_v29, %s2754_s4 }
0x1d48   :  { %v1605_v31 = vpop.permute.xlu1 %1604 }
0x1d49   :  { %v1607_v36 = vadd.f32 %v1605_v31, %v1597_v30  ;;  %v1199_v30 = vadd.f32 %v3078_v56, %v3051_v8 }
0x1d4b   :  { %2716 = vtanh.f32 %v1607_v36 }
0x1d55   :  { %v2717_v32 = vpop.eup %2716 }
0x1d56   :  { %1610 = vrot.lane.b32.xlu0 %v2717_v32, %s2753_s29 }
0x1dc8   :  { %v1611_v33 = vpop.permute.xlu0 %1610 }
0x1dc9   :  { %v1613_v35 = vmul.f32 %v2715_v27, %v1611_v33 }
0x1dcb   :  { %1617 = vrot.lane.b32.xlu1 %v1613_v35, %s2754_s4 }
0x1e3d   :  { %v1618_v37 = vpop.permute.xlu1 %1617 }
0x1e3e   :  { %2455 = vmatmul.mubr.msk.f32.vlgmr.msra.gmra.mrb[24].mxu0 %vm205_vm2, %v1618_v37 }
0x1e3f   :  { %2599 = vmatpush3.bf16.msra.mxu0 %v3015_v52  ;;  %2476 = vmatprep.mubr.msk.f32.mxu0 %vm2751_vm1, %v2752_v4 }
0x1e40   :  { %2600 = vmatprep.subr.bf16.mxu0 %v2750_v0 }
0x1e43   :  { %2602 = vmatpush3.bf16.msra.mxu0 %v3025_v55 }
0x1e44   :  { %2609 = vmatprep.subr.bf16.mxu0 %v2750_v0 }
0x1f11   :  { %v1687_v62 = vpop.f32.mrb[24].mxu0 }
0x1f12   :  { %v1691_v42 = vadd.f32 %v1687_v62, %v1196_v41  ;;  %v2456_v43 = vpop.f32.mrb[25].mxu0  ;;  %v2755_v62 = vmov 0  }
0x1f13   :  { %2621 = vset.pattern.permute.xlu0 %v2755_v62 }
0x1f14   :  { %2718 = vtanh.f32 %v1691_v42  ;;  %v2162_v45 = vmul.f32 -1.442695, %v1691_v42  ;;  %v2022_v42 = vld [vmem:[%s3181_s1] sm:$0xff] }
0x1f16   :  { %2720 = vpow2.f32 %v2162_v45 }
0x1f1e   :  { %v2719_v44 = vpop.eup %2718 }
0x1f1f   :  { %1701 = vrot.lane.b32.xlu0 %v2719_v44, %s2753_s29 }
0x1f20   :  { %v2721_v46 = vpop.eup %2720 }
0x1f21   :  { %v1695_v47 = vadd.f32 1.0, %v2721_v46 }
0x1f23   :  { %2722 = vrcp.f32 %v1695_v47  ;;  %v2029_v47 = vld [vmem:[%s3182_s8] sm:$0xff] }
0x1f2d   :  { %v2723_v34 = vpop.eup %2722 }
0x1f2e   :  { %v1699_v50 = vmul.f32 %v2723_v34, %v1607_v36 }
0x1f91   :  { %v1702_v48 = vpop.permute.xlu0 %1701 }
0x1f92   :  { %v1704_v49 = vmul.f32 %v2723_v34, %v1702_v48  ;;  %v2031_v48 = vld [vmem:[%s3182_s8 + $0x10] sm:$0xff] }
0x1f94   :  { %1706 = vrot.lane.b32.xlu1 %v1704_v49, %s2754_s4 }
0x2006   :  { %v1707_v51 = vpop.permute.xlu1 %1706 }
0x2007   :  { %v1709_v40 = vadd.f32 %v1707_v51, %v1699_v50  ;;  %v2032_v50 = vld [vmem:[%s3182_s8 + $0x18] sm:$0xff] }
0x2008   :  { %v2613_v51 = vpack.c.bf16 %v2032_v50, %v2031_v48 }
0x2009   :  { %2724 = vtanh.f32 %v1709_v40 }
0x2013   :  { %v2725_v53 = vpop.eup %2724 }
0x2014   :  { %1712 = vrot.lane.b32.xlu0 %v2725_v53, %s2753_s29  ;;  %v15_v53 = vstv %s3183_s9 }
0x2015   :  { %16 = vst [vmem:[#allocation5] sm:$0x1] %v15_v53 }
0x2086   :  { %v1713_v54 = vpop.permute.xlu0 %1712 }
0x2087   :  { %v1715_v57 = vmul.f32 %v2723_v34, %v1713_v54  ;;  %v2030_v34 = vld [vmem:[%s3182_s8 + $0x8] sm:$0xff] }
0x2088   :  { %v2610_v49 = vpack.c.bf16 %v2030_v34, %v2029_v47 }
0x2089   :  { %1719 = vrot.lane.b32.xlu1 %v1715_v57, %s2754_s4 }
0x20fb   :  { %v1720_v60 = vpop.permute.xlu1 %1719 }
0x20fc   :  { %2466 = vmatmul.mubr.msk.f32.vlgmr.msra.gmra.mrb[16].mxu1 %vm205_vm2, %v1720_v60 }
0x20fd   :  { %2605 = vmatpush3.bf16.msra.mxu1 %v3015_v52  ;;  %2487 = vmatprep.mubr.msk.f32.mxu1 %vm2751_vm1, %v2752_v4 }
0x20fe   :  { %2606 = vmatprep.subr.bf16.mxu1 %v2750_v0 }
0x2101   :  { %2608 = vmatpush3.bf16.msra.mxu1 %v3025_v55 }
0x21cf   :  { %v1789_v1 = vpop.f32.mrb[16].mxu1 }
0x21d0   :  { %v1793_v2 = vadd.f32 %v1789_v1, %v1197_v63  ;;  %v2467_v3 = vpop.f32.mrb[17].mxu1 }
0x21d2   :  { %2726 = vtanh.f32 %v1793_v2  ;;  %v2164_v6 = vmul.f32 -1.442695, %v1793_v2  ;;  %v2169_v2 = vld [vmem:[#allocation5] ss:$0 sm:$0xff] }
0x21d4   :  { %2728 = vpow2.f32 %v2164_v6 }
0x21dc   :  { %v2727_v5 = vpop.eup %2726 }
0x21dd   :  { %1803 = vrot.lane.b32.xlu0 %v2727_v5, %s2753_s29 }
0x21de   :  { %v2729_v52 = vpop.eup %2728 }
0x21df   :  { %v1797_v7 = vadd.f32 1.0, %v2729_v52 }
0x21e1   :  { %2730 = vrcp.f32 %v1797_v7 }
0x21eb   :  { %v2731_v9 = vpop.eup %2730 }
0x21ec   :  { %v1801_v55 = vmul.f32 %v2731_v9, %v1709_v40 }
0x224f   :  { %v1804_v12 = vpop.permute.xlu0 %1803 }
0x2250   :  { %v1806_v10 = vmul.f32 %v2731_v9, %v1804_v12 }
0x2252   :  { %1808 = vrot.lane.b32.xlu1 %v1806_v10, %s2754_s4 }
0x22c4   :  { %v1809_v13 = vpop.permute.xlu1 %1808 }
0x22c5   :  { %v1811_v39 = vadd.f32 %v1809_v13, %v1801_v55 }
0x22c7   :  { %2732 = vtanh.f32 %v1811_v39 }
0x22d1   :  { %v2733_v61 = vpop.eup %2732 }
0x22d2   :  { %1814 = vrot.lane.b32.xlu0 %v2733_v61, %s2753_s29 }
0x2344   :  { %v1815_v11 = vpop.permute.xlu0 %1814 }
0x2345   :  { %v1817_v59 = vmul.f32 %v2731_v9, %v1815_v11 }
0x2347   :  { %1821 = vrot.lane.b32.xlu1 %v1817_v59, %s2754_s4 }
0x23b9   :  { %v1822_v14 = vpop.permute.xlu1 %1821 }
0x23ba   :  { %2477 = vmatmul.mubr.msk.f32.vlgmr.msra.gmra.mrb[26].mxu0 %vm205_vm2, %v1822_v14 }
0x23bb   :  { %2498 = vmatprep.mubr.msk.f32.mxu0 %vm2751_vm1, %v2752_v4  ;;  %2611 = vmatpush3.bf16.msra.mxu0 %v2610_v49 }
0x23bc   :  { %2612 = vmatprep.subr.bf16.mxu0 %v2750_v0 }
0x23bf   :  { %2614 = vmatpush3.bf16.msra.mxu0 %v2613_v51 }
0x248d   :  { %v1891_v15 = vpop.f32.mrb[26].mxu0 }
0x248e   :  { %v1895_v16 = vadd.f32 %v1891_v15, %v1198_v38  ;;  %v2478_v17 = vpop.f32.mrb[27].mxu0 }
0x2490   :  { %2734 = vtanh.f32 %v1895_v16  ;;  %v2166_v19 = vmul.f32 -1.442695, %v1895_v16 }
0x2492   :  { %2736 = vpow2.f32 %v2166_v19 }
0x249a   :  { %v2735_v18 = vpop.eup %2734 }
0x249b   :  { %1905 = vrot.lane.b32.xlu0 %v2735_v18, %s2753_s29 }
0x249c   :  { %v2737_v20 = vpop.eup %2736 }
0x249d   :  { %v1899_v21 = vadd.f32 1.0, %v2737_v20 }
0x249f   :  { %2738 = vrcp.f32 %v1899_v21 }
0x24a9   :  { %v2739_v22 = vpop.eup %2738 }
0x24aa   :  { %v1903_v4 = vmul.f32 %v2739_v22, %v1811_v39 }
0x250d   :  { %v1906_v23 = vpop.permute.xlu0 %1905 }
0x250e   :  { %v1908_v24 = vmul.f32 %v2739_v22, %v1906_v23 }
0x2510   :  { %1910 = vrot.lane.b32.xlu1 %v1908_v24, %s2754_s4 }
0x2582   :  { %v1911_v25 = vpop.permute.xlu1 %1910 }
0x2583   :  { %v1913_v58 = vadd.f32 %v1911_v25, %v1903_v4 }
0x2585   :  { %2740 = vtanh.f32 %v1913_v58 }
0x258f   :  { %v2741_v26 = vpop.eup %2740 }
0x2590   :  { %1916 = vrot.lane.b32.xlu0 %v2741_v26, %s2753_s29 }
0x2602   :  { %v1917_v27 = vpop.permute.xlu0 %1916 }
0x2603   :  { %v1919_v28 = vmul.f32 %v2739_v22, %v1917_v27 }
0x2605   :  { %1923 = vrot.lane.b32.xlu1 %v1919_v28, %s2754_s4 }
0x2677   :  { %v1924_v29 = vpop.permute.xlu1 %1923 }
0x2678   :  { %2488 = vmatmul.mubr.msk.f32.vlgmr.msra.gmra.mrb[18].mxu1 %vm205_vm2, %v1924_v29 }
0x274b   :  { %v1993_v31 = vpop.f32.mrb[18].mxu1 }
0x274c   :  { %v1997_v36 = vadd.f32 %v1993_v31, %v1199_v30  ;;  %v2489_v32 = vpop.f32.mrb[19].mxu1 }
0x274e   :  { %2742 = vtanh.f32 %v1997_v36  ;;  %v2168_v35 = vmul.f32 -1.442695, %v1997_v36 }
0x2750   :  { %2744 = vpow2.f32 %v2168_v35 }
0x2758   :  { %v2743_v33 = vpop.eup %2742 }
0x2759   :  { %2007 = vrot.lane.b32.xlu0 %v2743_v33, %s2753_s29 }
0x275a   :  { %v2745_v37 = vpop.eup %2744 }
0x275b   :  { %v2001_v41 = vadd.f32 1.0, %v2745_v37 }
0x275d   :  { %2746 = vrcp.f32 %v2001_v41  ;;  %2025 = vperm.xlu0 %2621, %v2022_v42  }
0x2767   :  { %v2747_v8 = vpop.eup %2746 }
0x2768   :  { %v2005_v44 = vmul.f32 %v2747_v8, %v1913_v58 }
0x27cb   :  { %v2008_v56 = vpop.permute.xlu0 %2007 }
0x27cc   :  { %v2010_v43 = vmul.f32 %v2747_v8, %v2008_v56 }
0x27ce   :  { %2012 = vrot.lane.b32.xlu1 %v2010_v43, %s2754_s4 }
0x27dc   :  { %v2026_v57 = vpop.permute.xlu0 %2025 }
0x2840   :  { %v2013_v45 = vpop.permute.xlu1 %2012 }
0x2841   :  { %v2015_v46 = vadd.f32 %v2013_v45, %v2005_v44 }
0x2843   :  { %2748 = vtanh.f32 %v2015_v46 }
0x284d   :  { %v2749_v40 = vpop.eup %2748 }
0x284e   :  { %2018 = vrot.lane.b32.xlu1 %v2749_v40, %s2753_s29 }
0x28c0   :  { %v2019_v54 = vpop.permute.xlu1 %2018 }
0x28c1   :  { %v2021_v60 = vmul.f32 %v2747_v8, %v2019_v54 }
0x28c3   :  { %v2028_v63 = vmul.f32 %v2026_v57, %v2021_v60 }
0x28c5   :  { %2041 = vrot.lane.b32.xlu1 %v2028_v63, %s2754_s4 }
0x2937   :  { %v2042_v1 = vpop.permute.xlu1 %2041 }
0x2938   :  { %2499 = vmatmul.mubr.msk.f32.vlgmr.msra.gmra.mrb[28].mxu0 %vm205_vm2, %v2042_v1 }
0x2a0b   :  { %v2111_v0 = vpop.f32.mrb[28].mxu0 }
0x2a0c   :  { %v2112_v3 = vadd.f32 %v2169_v2, %v2111_v0  ;;  %v2500_v5 = vpop.f32.mrb[29].mxu0 }
0x2a0e   :  { %2116 = vst.msk [vmem:[%s3184_s10] sm:$0xff] %vm2115_vm3, %v2112_v3 }

</bundles_post_ra>
